<compile_context>
chip_gen: v7x
topology: tpu7x:2x2x1
jax: 0.10.0
libtpu: 0.0.40
codegen_flags: <defaults>
</compile_context>

<pallas_src>
import functools

import jax
import jax.numpy as jnp
from jax import lax
from jax.experimental import pallas as pl
from jax.experimental.pallas import tpu as pltpu

KH, KW = 3, 3
EPS = 1e-5


def _conv_block_kernel(x_ref, w_ref, b_ref, conv_ref, act_ref,
                       *, cin, width, rows, tile_rows, hw):
    # x_ref   : [H+2, W+2, Cin]   whole padded image for this batch (DMA'd once per batch)
    # w_ref   : [KH, CT, KW*Cin]  tap-folded weights for this Cout tile, cols ordered (kw, cin)
    # b_ref   : [CT, 1]
    # conv_ref: [CT, HW]          lane-dense conv output block (== NCHW)
    # act_ref : [CT, HW]          relu(instance_norm(conv))
    ct = conv_ref.shape[0]
    thw = tile_rows * width
    n_chunks = rows // tile_rows
    kwcin = KW * cin

    def conv_chunk(row0):
        # Three tap-folded matmuls (K = 3*Cin) with lane-dense f32 accumulation.
        acc = jnp.zeros((ct, thw), jnp.float32)
        for kh in range(KH):
            x_kh = x_ref[pl.ds(row0 + kh, tile_rows)]                 # [TH, W+2, Cin]
            # TODO(synk): kw = 1,2 slices are sublane-misaligned (relayout copies); a
            # W-on-lanes layout + pltpu.roll for the kw shift would remove them.
            patch = jnp.concatenate(
                [x_kh[:, kw:kw + width, :] for kw in range(KW)], axis=-1,
            ).reshape(thw, kwcin)                                     # [TH*W, 3*Cin]
            acc = acc + lax.dot_general(
                w_ref[kh], patch, (((1,), (1,)), ((), ())),
                preferred_element_type=jnp.float32)                   # [CT, TH*W]
        conv_c = acc + b_ref[...].astype(jnp.float32)
        # Per-channel partial stats in f32 (lane reductions).
        s = jnp.sum(conv_c, axis=1, keepdims=True)
        sq = jnp.sum(conv_c * conv_c, axis=1, keepdims=True)
        return conv_c, s, sq

    if n_chunks == 1:
        conv_c, s_tot, sq_tot = conv_chunk(0)
        conv_ref[...] = conv_c.astype(conv_ref.dtype)
    else:
        def body(i, carry):
            s_acc, sq_acc = carry
            off = pl.multiple_of(i * thw, 128)        # thw % 128 == 0 (checked in wrapper)
            conv_c, s, sq = conv_chunk(i * tile_rows)
            conv_ref[:, pl.ds(off, thw)] = conv_c.astype(conv_ref.dtype)
            return s_acc + s, sq_acc + sq

        s_tot, sq_tot = lax.fori_loop(
            0, n_chunks, body,
            (jnp.zeros((ct, 1), jnp.float32), jnp.zeros((ct, 1), jnp.float32)))

    # InstanceNorm (biased variance over H*W, eps under rsqrt, no affine), then ReLU.
    # Stats come from the f32 accumulator (E[x^2]-mean^2 in f32 with a >=0 clamp).
    inv_hw = 1.0 / float(hw)
    mean = s_tot * inv_hw
    var = jnp.maximum(sq_tot * inv_hw - mean * mean, 0.0)
    scale = lax.rsqrt(var + EPS)

    if n_chunks == 1:
        c = conv_ref[...].astype(jnp.float32)
        act_ref[...] = jnp.maximum((c - mean) * scale, 0.0).astype(act_ref.dtype)
    else:
        # Chunked epilogue: stream the resident conv block from VMEM in lane chunks.
        def fin(i, carry):
            off = pl.multiple_of(i * thw, 128)
            c = conv_ref[:, pl.ds(off, thw)].astype(jnp.float32)
            act_ref[:, pl.ds(off, thw)] = jnp.maximum((c - mean) * scale, 0.0
                                                      ).astype(act_ref.dtype)
            return carry

        lax.fori_loop(0, n_chunks, fin, 0)


def _pick_row_tile(H, W, target_lanes=1024):
    """Divisor TH of H with TH*W % 128 == 0, first one reaching target_lanes (else largest)."""
    best = None
    for th in range(1, H + 1):
        if H % th == 0 and (th * W) % 128 == 0:
            best = th
            if th * W >= target_lanes:
                break
    return best if best is not None else H


def _padded_tile_bytes(shape, itemsize):
    """VMEM bytes of a tensor with its last two dims padded to the (8, 128) tiling."""
    shape = (1, 1) + tuple(shape)
    lead = 1
    for d in shape[:-2]:
        lead *= d
    sub = -(-shape[-2] // 8) * 8
    lane = -(-shape[-1] // 128) * 128
    return lead * sub * lane * itemsize


def _vmem_capacity_bytes():
    try:
        return int(pltpu.get_tpu_info().vmem_capacity_bytes)
    except Exception:
        return 64 << 20            # v7x physical VMEM; conservative for 128 MiB v5e/v6e


def _vmem_estimate(H, W, Cin, HW, ct, th, x_isz, w_isz):
    """Explicit per-grid-step VMEM budget: double-buffered blocks + in-kernel temps."""
    inp = 2 * _padded_tile_bytes((H + 2, W + 2, Cin), x_isz)
    wgt = 2 * _padded_tile_bytes((KH, ct, KW * Cin), w_isz)
    bia = 2 * _padded_tile_bytes((ct, 1), w_isz)
    outs = 2 * 2 * _padded_tile_bytes((ct, HW), x_isz)
    thw = th * W
    temps = (3 * _padded_tile_bytes((th, W + 2, Cin), x_isz)
             + _padded_tile_bytes((thw, KW * Cin), max(x_isz, 4))
             + 2 * _padded_tile_bytes((ct, thw), 4))
    return inp + wgt + bia + outs + temps


def _pick_cout_tile(Cout, budget, est_fn):
    cands = [d for d in range(Cout, 0, -1)
             if Cout % d == 0 and (d % 8 == 0 or d == Cout)]
    for d in cands:
        if est_fn(d) <= budget:
            return d
    return cands[-1]


def conv_block(x_nchw, weight, bias, *, row_tile=None, cout_tile=None):
    """x_nchw: [N, Cin, H, W]; weight: [Cout, Cin, 3, 3]; bias: [Cout].
    Returns (conv, act), both [N, Cout, H, W] (matching the PyTorch Conv_block)."""
    N, Cin, H, W = x_nchw.shape
    Cout = weight.shape[0]
    HW = H * W

    if row_tile is None:
        row_tile = _pick_row_tile(H, W)
    if H % row_tile != 0:
        raise ValueError(f"row_tile={row_tile} must divide H={H}")
    if H // row_tile > 1 and (row_tile * W) % 128 != 0:
        raise ValueError("row_tile * W must be a multiple of 128 when H is chunked")

    x_isz = jnp.dtype(x_nchw.dtype).itemsize
    w_isz = jnp.dtype(weight.dtype).itemsize
    capacity = _vmem_capacity_bytes()
    est_fn = lambda ct: _vmem_estimate(H, W, Cin, HW, ct, row_tile, x_isz, w_isz)

    if cout_tile is None:
        cout_tile = _pick_cout_tile(Cout, int(0.7 * capacity), est_fn)
    if Cout % cout_tile != 0:
        raise ValueError(f"cout_tile={cout_tile} must divide Cout={Cout}")
    if cout_tile % 8 != 0 and cout_tile != Cout:
        raise ValueError("cout_tile must be a multiple of 8 (or equal Cout)")
    n_ct = Cout // cout_tile

    vmem_limit = int(min(max(32 << 20, int(1.5 * est_fn(cout_tile)) + (8 << 20)),
                         int(0.9 * capacity)))

    # Glue: NCHW -> NHWC + 'same' zero pad.  One padded copy in HBM; the kernel fetches the
    # whole per-batch block once (constant block index along the inner Cout-tile axis).
    x_nhwc = jnp.transpose(x_nchw, (0, 2, 3, 1))
    xp = jnp.pad(x_nhwc, ((0, 0), (1, 1), (1, 1), (0, 0)))            # [N, H+2, W+2, Cin]

    # weight [Cout, Cin, KH, KW] -> [KH, Cout, KW*Cin] with columns ordered (kw, cin).
    w_arr = jnp.transpose(weight, (2, 0, 3, 1)).reshape(KH, Cout, KW * Cin)
    b_arr = bias.reshape(Cout, 1)

    kernel = functools.partial(_conv_block_kernel, cin=Cin, width=W, rows=H,
                               tile_rows=row_tile, hw=HW)

    out_spec = pl.BlockSpec((None, cout_tile, HW), lambda n, c: (n, c, 0))
    conv_flat, act_flat = pl.pallas_call(
        kernel,
        out_shape=(jax.ShapeDtypeStruct((N, Cout, HW), x_nchw.dtype),
                   jax.ShapeDtypeStruct((N, Cout, HW), x_nchw.dtype)),
        grid=(N, n_ct),
        in_specs=[
            pl.BlockSpec((None, H + 2, W + 2, Cin), lambda n, c: (n, 0, 0, 0)),
            # TODO(synk): pipeline_mode=pl.Buffered(1) on the weight/bias specs would trim one
            # buffer of VMEM on v7x.
            pl.BlockSpec((KH, cout_tile, KW * Cin), lambda n, c: (0, c, 0)),
            pl.BlockSpec((cout_tile, 1), lambda n, c: (c, 0)),
        ],
        out_specs=(out_spec, out_spec),
        compiler_params=pltpu.CompilerParams(
            dimension_semantics=("parallel", "parallel"),
            vmem_limit_bytes=vmem_limit),
    )(xp, w_arr, b_arr)

    # Outputs are already channel-major (NCHW); only a free reshape remains.
    return conv_flat.reshape(N, Cout, H, W), act_flat.reshape(N, Cout, H, W)


def _reference(x, weight, bias):
    conv = lax.conv_general_dilated(
        x, weight, window_strides=(1, 1), padding="SAME",
        dimension_numbers=("NCHW", "OIHW", "NCHW")) + bias[None, :, None, None]
    mean = jnp.mean(conv, axis=(2, 3), keepdims=True)
    var = jnp.mean((conv - mean) ** 2, axis=(2, 3), keepdims=True)
    act = jnp.maximum((conv - mean) * lax.rsqrt(var + EPS), 0.0)
    return conv, act


if __name__ == "__main__":
    key = jax.random.PRNGKey(0)

    def make_case(k, N, Cin, H, W, Cout):
        kx, kw_, kb = jax.random.split(k, 3)
        fan_in = Cin * KH * KW
        bound = 1.0 / (fan_in ** 0.5)
        x = jax.random.normal(kx, (N, Cin, H, W), jnp.float32)
        w = jax.random.uniform(kw_, (Cout, Cin, KH, KW), jnp.float32, -bound, bound)
        b = jax.random.uniform(kb, (Cout,), jnp.float32, -bound, bound)
        return x, w, b

    k1, k2 = jax.random.split(key)

    # Case 1: default auto tiling (single row chunk, single Cout tile).
    # Case 2: same data, explicit row_tile=8 -> exercises the chunked conv + chunked epilogue.
    x, w, b = make_case(k1, 2, 4, 16, 16, 8)
    ref_conv, ref_act = _reference(x, w, b)
    for rt in (None, 8):
        fn = jax.jit(functools.partial(conv_block, row_tile=rt))
        conv, act = fn(x, w, b)
        jax.block_until_ready((conv, act))
        assert conv.shape == (2, 8, 16, 16) and act.shape == (2, 8, 16, 16)
        assert jnp.allclose(conv, ref_conv, atol=1e-3, rtol=1e-3), f"conv mismatch (row_tile={rt})"
        assert jnp.allclose(act, ref_act, atol=1e-3, rtol=1e-3), f"act mismatch (row_tile={rt})"

    # Case 3: N=1 with Cout tiling (cout_tile=8 over Cout=16) -> exercises the parallel Cout
    # grid axis (gives v7x's second TensorCore work at batch 1) plus chunked rows.
    x3, w3, b3 = make_case(k2, 1, 8, 16, 16, 16)
    ref_conv3, ref_act3 = _reference(x3, w3, b3)
    fn3 = jax.jit(functools.partial(conv_block, row_tile=8, cout_tile=8))
    conv3, act3 = fn3(x3, w3, b3)
    jax.block_until_ready((conv3, act3))
    assert conv3.shape == (1, 16, 16, 16) and act3.shape == (1, 16, 16, 16)
    assert jnp.allclose(conv3, ref_conv3, atol=1e-3, rtol=1e-3), "conv mismatch (cout tiled)"
    assert jnp.allclose(act3, ref_act3, atol=1e-3, rtol=1e-3), "act mismatch (cout tiled)"

    print("KERNEL_OK")
</pallas_src>

<mosaic_0001>
module attributes {stable_mosaic.version = 11 : i64} {
  func.func @_conv_block_kernel(%arg0: i32, %arg1: i32, %arg2: memref<1x18x18x4xf32, #tpu.memory_space<vmem>>, %arg3: memref<3x8x12xf32, #tpu.memory_space<vmem>>, %arg4: memref<8x1xf32, #tpu.memory_space<vmem>>, %arg5: memref<1x8x256xf32, #tpu.memory_space<vmem>>, %arg6: memref<1x8x256xf32, #tpu.memory_space<vmem>>) attributes {dimension_semantics = [#tpu.dimension_semantics<parallel>, #tpu.dimension_semantics<parallel>], iteration_bounds = array<i64: 2, 1>, scalar_prefetch = 0 : i64, scratch_operands = 0 : i64, tpu.core_type = #tpu.core_type<tc>, window_params = [{transform_indices = @transform_0, window_bounds = array<i64: 1, 18, 18, 4>}, {transform_indices = @transform_1, window_bounds = array<i64: 3, 8, 12>}, {transform_indices = @transform_2, window_bounds = array<i64: 8, 1>}, {transform_indices = @transform_3, window_bounds = array<i64: 1, 8, 256>}, {transform_indices = @transform_4, window_bounds = array<i64: 1, 8, 256>}]} {
    %cst = arith.constant 0.000000e+00 : f32
    %0 = vector.broadcast %cst : f32 to vector<8x256xf32>
    %c0 = arith.constant 0 : index
    %c0_0 = arith.constant 0 : index
    %c0_1 = arith.constant 0 : index
    %c0_2 = arith.constant 0 : index
    %1 = vector.load %arg2[%c0, %c0_0, %c0_1, %c0_2] : memref<1x18x18x4xf32, #tpu.memory_space<vmem>>, vector<1x16x18x4xf32>
    %2 = vector.shape_cast %1 : vector<1x16x18x4xf32> to vector<16x18x4xf32>
    %3 = vector.extract_strided_slice %2 {offsets = [0, 0, 0], sizes = [16, 16, 4], strides = [1, 1, 1]} : vector<16x18x4xf32> to vector<16x16x4xf32>
    %4 = vector.extract_strided_slice %2 {offsets = [0, 1, 0], sizes = [16, 16, 4], strides = [1, 1, 1]} : vector<16x18x4xf32> to vector<16x16x4xf32>
    %5 = vector.extract_strided_slice %2 {offsets = [0, 2, 0], sizes = [16, 16, 4], strides = [1, 1, 1]} : vector<16x18x4xf32> to vector<16x16x4xf32>
    %6 = tpu.concatenate %3, %4, %5 in 2 : vector<16x16x4xf32>, vector<16x16x4xf32>, vector<16x16x4xf32> -> vector<16x16x12xf32>
    %7 = vector.shape_cast %6 : vector<16x16x12xf32> to vector<256x12xf32>
    %c0_3 = arith.constant 0 : index
    %c0_4 = arith.constant 0 : index
    %c0_5 = arith.constant 0 : index
    %8 = vector.load %arg3[%c0_3, %c0_4, %c0_5] : memref<3x8x12xf32, #tpu.memory_space<vmem>>, vector<1x8x12xf32>
    %9 = vector.shape_cast %8 : vector<1x8x12xf32> to vector<8x12xf32>
    %cst_6 = arith.constant dense<0.000000e+00> : vector<8x256xf32>
    %10 = tpu.matmul %9, %7, %cst_6 {dimension_numbers = #tpu.dot_dimension_numbers<[1], [1], [0], [0], [0, 0, 1, 0], [], []>} : vector<8x12xf32>, vector<256x12xf32>, vector<8x256xf32> -> vector<8x256xf32>
    %11 = arith.addf %0, %10 : vector<8x256xf32>
    %c0_7 = arith.constant 0 : index
    %c1 = arith.constant 1 : index
    %c0_8 = arith.constant 0 : index
    %c0_9 = arith.constant 0 : index
    %12 = vector.load %arg2[%c0_7, %c1, %c0_8, %c0_9] : memref<1x18x18x4xf32, #tpu.memory_space<vmem>>, vector<1x16x18x4xf32>
    %13 = vector.shape_cast %12 : vector<1x16x18x4xf32> to vector<16x18x4xf32>
    %14 = vector.extract_strided_slice %13 {offsets = [0, 0, 0], sizes = [16, 16, 4], strides = [1, 1, 1]} : vector<16x18x4xf32> to vector<16x16x4xf32>
    %15 = vector.extract_strided_slice %13 {offsets = [0, 1, 0], sizes = [16, 16, 4], strides = [1, 1, 1]} : vector<16x18x4xf32> to vector<16x16x4xf32>
    %16 = vector.extract_strided_slice %13 {offsets = [0, 2, 0], sizes = [16, 16, 4], strides = [1, 1, 1]} : vector<16x18x4xf32> to vector<16x16x4xf32>
    %17 = tpu.concatenate %14, %15, %16 in 2 : vector<16x16x4xf32>, vector<16x16x4xf32>, vector<16x16x4xf32> -> vector<16x16x12xf32>
    %18 = vector.shape_cast %17 : vector<16x16x12xf32> to vector<256x12xf32>
    %c1_10 = arith.constant 1 : index
    %c0_11 = arith.constant 0 : index
    %c0_12 = arith.constant 0 : index
    %19 = vector.load %arg3[%c1_10, %c0_11, %c0_12] : memref<3x8x12xf32, #tpu.memory_space<vmem>>, vector<1x8x12xf32>
    %20 = vector.shape_cast %19 : vector<1x8x12xf32> to vector<8x12xf32>
    %cst_13 = arith.constant dense<0.000000e+00> : vector<8x256xf32>
    %21 = tpu.matmul %20, %18, %cst_13 {dimension_numbers = #tpu.dot_dimension_numbers<[1], [1], [0], [0], [0, 0, 1, 0], [], []>} : vector<8x12xf32>, vector<256x12xf32>, vector<8x256xf32> -> vector<8x256xf32>
    %22 = arith.addf %11, %21 : vector<8x256xf32>
    %c0_14 = arith.constant 0 : index
    %c2 = arith.constant 2 : index
    %c0_15 = arith.constant 0 : index
    %c0_16 = arith.constant 0 : index
    %23 = vector.load %arg2[%c0_14, %c2, %c0_15, %c0_16] : memref<1x18x18x4xf32, #tpu.memory_space<vmem>>, vector<1x16x18x4xf32>
    %24 = vector.shape_cast %23 : vector<1x16x18x4xf32> to vector<16x18x4xf32>
    %25 = vector.extract_strided_slice %24 {offsets = [0, 0, 0], sizes = [16, 16, 4], strides = [1, 1, 1]} : vector<16x18x4xf32> to vector<16x16x4xf32>
    %26 = vector.extract_strided_slice %24 {offsets = [0, 1, 0], sizes = [16, 16, 4], strides = [1, 1, 1]} : vector<16x18x4xf32> to vector<16x16x4xf32>
    %27 = vector.extract_strided_slice %24 {offsets = [0, 2, 0], sizes = [16, 16, 4], strides = [1, 1, 1]} : vector<16x18x4xf32> to vector<16x16x4xf32>
    %28 = tpu.concatenate %25, %26, %27 in 2 : vector<16x16x4xf32>, vector<16x16x4xf32>, vector<16x16x4xf32> -> vector<16x16x12xf32>
    %29 = vector.shape_cast %28 : vector<16x16x12xf32> to vector<256x12xf32>
    %c2_17 = arith.constant 2 : index
    %c0_18 = arith.constant 0 : index
    %c0_19 = arith.constant 0 : index
    %30 = vector.load %arg3[%c2_17, %c0_18, %c0_19] : memref<3x8x12xf32, #tpu.memory_space<vmem>>, vector<1x8x12xf32>
    %31 = vector.shape_cast %30 : vector<1x8x12xf32> to vector<8x12xf32>
    %cst_20 = arith.constant dense<0.000000e+00> : vector<8x256xf32>
    %32 = tpu.matmul %31, %29, %cst_20 {dimension_numbers = #tpu.dot_dimension_numbers<[1], [1], [0], [0], [0, 0, 1, 0], [], []>} : vector<8x12xf32>, vector<256x12xf32>, vector<8x256xf32> -> vector<8x256xf32>
    %33 = arith.addf %22, %32 : vector<8x256xf32>
    %c0_21 = arith.constant 0 : index
    %c0_22 = arith.constant 0 : index
    %34 = vector.load %arg4[%c0_21, %c0_22] : memref<8x1xf32, #tpu.memory_space<vmem>>, vector<8x1xf32>
    %35 = vector.broadcast %34 : vector<8x1xf32> to vector<8x256xf32>
    %36 = arith.addf %33, %35 : vector<8x256xf32>
    %cst_23 = arith.constant dense<0.000000e+00> : vector<8xf32>
    %37 = vector.multi_reduction <add>, %36, %cst_23 [1] : vector<8x256xf32> to vector<8xf32>
    %38 = vector.shape_cast %37 : vector<8xf32> to vector<8x1xf32>
    %39 = arith.mulf %36, %36 : vector<8x256xf32>
    %cst_24 = arith.constant dense<0.000000e+00> : vector<8xf32>
    %40 = vector.multi_reduction <add>, %39, %cst_24 [1] : vector<8x256xf32> to vector<8xf32>
    %41 = vector.shape_cast %40 : vector<8xf32> to vector<8x1xf32>
    %c0_25 = arith.constant 0 : index
    %c0_26 = arith.constant 0 : index
    %c0_27 = arith.constant 0 : index
    %42 = vector.load %arg5[%c0_25, %c0_26, %c0_27] : memref<1x8x256xf32, #tpu.memory_space<vmem>>, vector<1x8x256xf32>
    %43 = vector.shape_cast %42 : vector<1x8x256xf32> to vector<8x256xf32>
    %44 = vector.shape_cast %36 : vector<8x256xf32> to vector<1x8x256xf32>
    tpu.vector_store %arg5[%c0_25, %c0_26, %c0_27], %44 {strides = array<i32>} : memref<1x8x256xf32, #tpu.memory_space<vmem>>, vector<1x8x256xf32>,
    %cst_28 = arith.constant 3.906250e-03 : f32
    %45 = vector.broadcast %cst_28 : f32 to vector<8x1xf32>
    %46 = arith.mulf %38, %45 : vector<8x1xf32>
    %cst_29 = arith.constant 3.906250e-03 : f32
    %47 = vector.broadcast %cst_29 : f32 to vector<8x1xf32>
    %48 = arith.mulf %41, %47 : vector<8x1xf32>
    %49 = arith.mulf %46, %46 : vector<8x1xf32>
    %50 = arith.subf %48, %49 : vector<8x1xf32>
    %cst_30 = arith.constant 0.000000e+00 : f32
    %51 = vector.broadcast %cst_30 : f32 to vector<8x1xf32>
    %52 = arith.maximumf %50, %51 : vector<8x1xf32>
    %cst_31 = arith.constant 9.99999974E-6 : f32
    %53 = vector.broadcast %cst_31 : f32 to vector<8x1xf32>
    %54 = arith.addf %52, %53 : vector<8x1xf32>
    %55 = math.rsqrt %54 : vector<8x1xf32>
    %c0_32 = arith.constant 0 : index
    %c0_33 = arith.constant 0 : index
    %c0_34 = arith.constant 0 : index
    %56 = vector.load %arg5[%c0_32, %c0_33, %c0_34] : memref<1x8x256xf32, #tpu.memory_space<vmem>>, vector<1x8x256xf32>
    %57 = vector.shape_cast %56 : vector<1x8x256xf32> to vector<8x256xf32>
    %58 = vector.broadcast %46 : vector<8x1xf32> to vector<8x256xf32>
    %59 = arith.subf %57, %58 : vector<8x256xf32>
    %60 = vector.broadcast %55 : vector<8x1xf32> to vector<8x256xf32>
    %61 = arith.mulf %59, %60 : vector<8x256xf32>
    %cst_35 = arith.constant 0.000000e+00 : f32
    %62 = vector.broadcast %cst_35 : f32 to vector<8x256xf32>
    %63 = arith.maximumf %61, %62 : vector<8x256xf32>
    %c0_36 = arith.constant 0 : index
    %c0_37 = arith.constant 0 : index
    %c0_38 = arith.constant 0 : index
    %64 = vector.load %arg6[%c0_36, %c0_37, %c0_38] : memref<1x8x256xf32, #tpu.memory_space<vmem>>, vector<1x8x256xf32>
    %65 = vector.shape_cast %64 : vector<1x8x256xf32> to vector<8x256xf32>
    %66 = vector.shape_cast %63 : vector<8x256xf32> to vector<1x8x256xf32>
    tpu.vector_store %arg6[%c0_36, %c0_37, %c0_38], %66 {strides = array<i32>} : memref<1x8x256xf32, #tpu.memory_space<vmem>>, vector<1x8x256xf32>,
    return
  }
  func.func @transform_0(%arg0: i32, %arg1: i32) -> (i32, i32, i32, i32) {
    %c0_i32 = arith.constant 0 : i32
    %c0_i32_0 = arith.constant 0 : i32
    %c0_i32_1 = arith.constant 0 : i32
    %c0_i32_2 = arith.constant 0 : i32
    return %arg0, %c0_i32, %c0_i32_0, %c0_i32_1 : i32, i32, i32, i32
  }
  func.func @transform_1(%arg0: i32, %arg1: i32) -> (i32, i32, i32) {
    %c0_i32 = arith.constant 0 : i32
    %c0_i32_0 = arith.constant 0 : i32
    %c0_i32_1 = arith.constant 0 : i32
    return %c0_i32, %arg1, %c0_i32_0 : i32, i32, i32
  }
  func.func @transform_2(%arg0: i32, %arg1: i32) -> (i32, i32) {
    %c0_i32 = arith.constant 0 : i32
    %c0_i32_0 = arith.constant 0 : i32
    return %arg1, %c0_i32 : i32, i32
  }
  func.func @transform_3(%arg0: i32, %arg1: i32) -> (i32, i32, i32) {
    %c0_i32 = arith.constant 0 : i32
    %c0_i32_0 = arith.constant 0 : i32
    return %arg0, %arg1, %c0_i32 : i32, i32, i32
  }
  func.func @transform_4(%arg0: i32, %arg1: i32) -> (i32, i32, i32) {
    %c0_i32 = arith.constant 0 : i32
    %c0_i32_0 = arith.constant 0 : i32
    return %arg0, %arg1, %c0_i32 : i32, i32, i32
  }
}

</mosaic_0001>

<bundles_post_ra>
// kernel: conv_block.1
= control target key start
LH: loop header
LB: loop body
LE: loop exit
PB: predicated region body
PF: predicated region fallthrough
CT: control target
= control target key end

     0   :  { %s3603_s15 = smov 0   ;;  %s3605_s16 = smov 0   ;;  %s5288_s0 = inlined_call_operand.vmem [shape: f32[2,18,18,4], index: 0, kind: input, shape index: {}]   ;;  %s5289_s1 = inlined_call_operand.vmem [shape: f32[3,8,12], index: 1, kind: input, shape index: {}]   ;;  %s5290_s2 = inlined_call_operand.vmem [shape: f32[8,1], index: 2, kind: input, shape index: {}]   ;;  %s5291_s3 = inlined_call_operand.vmem [shape: f32[2,8,256], index: 3, kind: output, shape index: {0}]   ;;  %s5292_s4 = inlined_call_operand.vmem [shape: f32[2,8,256], index: 4, kind: output, shape index: {1}]  }
   0x1   :  { %s3607_s17 = smov 0  }
   0x2 LB: > { %s27_s18 = sadd.s32 1, %s3569_s16  ;;  %p2545_p0 = scmp.ge.s32.totalorder %s3573_s17, 1  ;;  %s3573_s17 = sphi %s3607_s17, %s15_s17   ;;  %s3569_s16 = sphi %s3605_s16, %s5467_s16   ;;  %s3565_s15 = sphi %s3603_s15, %s5466_s15  }
   0x3   : > { %p29_p1 = scmp.ge.s32.totalorder %s27_s18, 2  ;;  %p199_p2 = scmp.lt.s32.totalorder %s3573_s17, 3 }
   0x5   : > { %s5469_s18 = smov (%p29_p1, %s27_s18), 0  ;;  %p200_p3 = pnand %p2545_p0, %p199_p2 }
   0x7   : > { %203 = sbr.rel (%p200_p3) target bundleno = 730 (0x2da), region = 32 }
   0xe   : > { %p246_p4 = scmp.lt.s32.totalorder %s3565_s15, 1  ;;  %vm550_vm0 = vcmask 1045504   ;;  %vm373_vm1 = vcmask 1046528   ;;  %s3575_s23 = smov 8   ;;  %vm1309_vm2 = vcmask 97280   ;;  %vm727_vm3 = vcmask 31744  }
   0xf   : > { %s3576_s24 = smov 4   ;;  %vm760_vm4 = vcmask 64512   ;;  %vm4450_vm5 = vmpackc.low %vm1309_vm2, %vm1309_vm2 }
  0x10   : > { %s5471_s15 = smov (!%p246_p4, %s3565_s15), 1 }
  0x11   : > { %s3002_s19 = smul.u32 432, %s5471_s15  ;;  %s2750_s7 = sshll.u32 %s5471_s15, 4 }
  0x12   : > { %s267_s10 = scalar_lea.vmem %s5291_s3, %s2750_s7  ;;  %s276_s13 = scalar_lea.vmem %s5292_s4, %s2750_s7 }
  0x13   : > { %s3627_s22 = scalar_lea.vmem %s5288_s0, %s3002_s19 }
  0x14   : > { %v3630_v0 = vld [vmem:[%s3627_s22 + $0xc0] sm:$0xff]  ;;  %v3633_v1 = vld [vmem:[%s3627_s22 + $0xc8] sm:$0xff]  ;;  %v303_v2 = vld [vmem:[%s3627_s22 + $0xd0] sm:$0x3] }
  0x15   : > { %5347 = vst [vmem:[#allocation2_spill] sm:$0xff] %v3630_v0  ;;  %5348 = vst [vmem:[#allocation3_spill] sm:$0xff] %v3633_v1  ;;  %v591_v3 = vrot.slane %v3630_v0, 2  ;;  %v592_v4 = vrot.slane %v3633_v1, 2  ;;  %v594_v5 = vrot.slane %v303_v2, 2  ;;  %v414_v6 = vrot.slane %v3630_v0, 1 }
  0x16   : > { %v3640_v7 = vld [vmem:[%s3627_s22] sm:$0xff]  ;;  %v3643_v8 = vld [vmem:[%s3627_s22 + $0x8] sm:$0xff]  ;;  %v415_v9 = vrot.slane %v3633_v1, 1  ;;  %v417_v10 = vrot.slane %v303_v2, 1  ;;  %v279_v11 = vld [vmem:[%s3627_s22 + $0x10] sm:$0x3] }
  0x17   : > { %5349 = vst [vmem:[#allocation4_spill] sm:$0xff] %v3640_v7  ;;  %5350 = vst [vmem:[#allocation5_spill] sm:$0xff] %v3643_v8  ;;  %v551_v12 = vrot.slane %v3640_v7, 2  ;;  %v552_v13 = vrot.slane %v3643_v8, 2  ;;  %v593_v14 = vsel %vm550_vm0, %v591_v3, %v592_v4  ;;  %v595_v15 = vsel %vm550_vm0, %v592_v4, %v594_v5  ;;  %v3653_v18 = vld [vmem:[%s3627_s22 + $0x18] sm:$0xff]  ;;  %v3656_v19 = vld [vmem:[%s3627_s22 + $0x20] sm:$0xff] }
  0x18   : > { %v554_v16 = vrot.slane %v279_v11, 2  ;;  %v374_v17 = vrot.slane %v3640_v7, 1  ;;  %5351 = vst [vmem:[#allocation6_spill] sm:$0xff] %v3653_v18  ;;  %5352 = vst [vmem:[#allocation7_spill] sm:$0xff] %v3656_v19  ;;  %v282_v20 = vld [vmem:[%s3627_s22 + $0x28] sm:$0x3]  ;;  %v3040_v21 = vpack.i.bf16 %v595_v15, %v593_v14  ;;  %v416_v22 = vsel %vm373_vm1, %v414_v6, %v415_v9 }
  0x19   : > { %v418_v23 = vsel %vm373_vm1, %v415_v9, %v417_v10  ;;  %v553_v24 = vsel %vm550_vm0, %v551_v12, %v552_v13  ;;  %v3663_v25 = vld [vmem:[%s3627_s22 + $0xd8] sm:$0xff]  ;;  %v3666_v26 = vld [vmem:[%s3627_s22 + $0xe0] sm:$0xff]  ;;  %v375_v29 = vrot.slane %v3643_v8, 1  ;;  %v377_v30 = vrot.slane %v279_v11, 1  ;;  %v306_v31 = vld [vmem:[%s3627_s22 + $0xe8] sm:$0x3] }
  0x1a   : > { %5353 = vst [vmem:[#allocation8_spill] sm:$0xff] %v3663_v25  ;;  %5354 = vst [vmem:[#allocation9_spill] sm:$0xff] %v3666_v26  ;;  %v3030_v27 = vpack.i.bf16 %v418_v23, %v416_v22  ;;  %v555_v28 = vsel %vm550_vm0, %v552_v13, %v554_v16  ;;  %3041 = vrot.lane.b32.xlu1 %v3040_v21, %s3575_s23  ;;  %v379_v33 = vrot.slane %v3653_v18, 1  ;;  %v3674_v34 = vrot.slane %v3656_v19, 1  ;;  %v283_v44 = vld [vmem:[%s3627_s22 + $0x30] sm:$0xff]  ;;  %v3700_v49 = vld [vmem:[%s3627_s22 + $0x38] sm:$0xff] }
  0x1b   : > { %v3045_v32 = vpack.i.bf16 %v555_v28, %v553_v24  ;;  %v382_v35 = vrot.slane %v282_v20, 1  ;;  %v376_v36 = vsel %vm373_vm1, %v374_v17, %v375_v29  ;;  %v378_v37 = vsel %vm373_vm1, %v375_v29, %v377_v30  ;;  %5355 = vst [vmem:[#allocation10_spill] sm:$0xff] %v3700_v49  ;;  %v285_v50 = vld [vmem:[%s3627_s22 + $0x40] sm:$0x3]  ;;  %v3711_v55 = vld [vmem:[%s3627_s22 + $0xf0] sm:$0xff]  ;;  %v3714_v56 = vld [vmem:[%s3627_s22 + $0xf8] sm:$0xff] }
  0x1c   : > { %3031 = vrot.lane.b32.xlu0 %v3030_v27, %s3576_s24  ;;  %v419_v38 = vrot.slane %v3663_v25, 1  ;;  %v3681_v39 = vrot.slane %v3666_v26, 1  ;;  %v3035_v40 = vpack.i.bf16 %v378_v37, %v376_v36  ;;  %v3685_v41 = vsel %vm373_vm1, %v379_v33, %v3674_v34  ;;  %5356 = vst [vmem:[#allocation11_spill] sm:$0xff] %v3711_v55  ;;  %5357 = vst [vmem:[#allocation12_spill] sm:$0xff] %v3714_v56  ;;  %v309_v61 = vld [vmem:[%s3627_s22 + $0x100] sm:$0x3] }
  0x1d   : > { %v383_v42 = vsel %vm373_vm1, %v3674_v34, %v382_v35  ;;  %v422_v43 = vrot.slane %v306_v31, 1  ;;  %v556_v47 = vrot.slane %v3653_v18, 2  ;;  %v3697_v48 = vrot.slane %v3656_v19, 2  ;;  %v286_v13 = vld [vmem:[%s3627_s22 + $0x48] sm:$0xff]  ;;  %v288_v21 = vld [vmem:[%s3627_s22 + $0x58] sm:$0x3] }
  0x1e   : > { %v3055_v45 = vpack.i.bf16 %v383_v42, %v3685_v41  ;;  %v3693_v46 = vsel %vm373_vm1, %v419_v38, %v3681_v39  ;;  %3046 = vrot.lane.b32.xlu1 %v3045_v32, %s3575_s23  ;;  %v559_v52 = vrot.slane %v282_v20, 2  ;;  %v596_v53 = vrot.slane %v3663_v25, 2  ;;  %v287_v20 = vld [vmem:[%s3627_s22 + $0x50] sm:$0xff]  ;;  %v310_v30 = vld [vmem:[%s3627_s22 + $0x108] sm:$0xff]  ;;  %v312_v32 = vld [vmem:[%s3627_s22 + $0x118] sm:$0x3] }
  0x1f   : > { %v423_v51 = vsel %vm373_vm1, %v3681_v39, %v422_v43  ;;  %v3708_v54 = vrot.slane %v3666_v26, 2  ;;  %v3720_v58 = vsel %vm550_vm0, %v556_v47, %v3697_v48  ;;  %v599_v59 = vrot.slane %v306_v31, 2  ;;  %v311_v31 = vld [vmem:[%s3627_s22 + $0x110] sm:$0xff]  ;;  %v297_v25 = vld [vmem:[%s3627_s22 + $0xa0] sm:$0x3]  ;;  %v320_v1 = vld [vmem:[%s3627_s22 + $0x158] sm:$0xff] }
  0x20   : > { %3036 = vrot.lane.b32.xlu0 %v3035_v40, %s3576_s24  ;;  %v3050_v57 = vpack.i.bf16 %v423_v51, %v3693_v46  ;;  %v384_v60 = vrot.slane %v283_v44, 1  ;;  %v560_v62 = vsel %vm550_vm0, %v3697_v48, %v559_v52  ;;  %v3730_v2 = vrot.slane %v3700_v49, 1  ;;  %v319_v8 = vld [vmem:[%s3627_s22 + $0x150] sm:$0xff] }
  0x21   : > { %v3727_v63 = vsel %vm550_vm0, %v596_v53, %v3708_v54  ;;  %v387_v3 = vrot.slane %v285_v50, 1  ;;  %v600_v4 = vsel %vm550_vm0, %v3708_v54, %v599_v59  ;;  %v424_v5 = vrot.slane %v3711_v55, 1  ;;  %v299_v0 = vld [vmem:[%s3627_s22 + $0xb0] sm:$0xff] }
  0x22   : > { %v3736_v6 = vrot.slane %v3714_v56, 1  ;;  %3056 = vrot.lane.b32.xlu1 %v3055_v45, %s3576_s24  ;;  %v3065_v9 = vpack.i.bf16 %v560_v62, %v3720_v58  ;;  %v3060_v10 = vpack.i.bf16 %v600_v4, %v3727_v63  ;;  %v3743_v11 = vsel %vm373_vm1, %v384_v60, %v3730_v2  ;;  %v289_v62 = vld [vmem:[%s3627_s22 + $0x60] sm:$0xff] }
  0x23   : > { %v427_v12 = vrot.slane %v309_v61, 1  ;;  %v388_v14 = vsel %vm373_vm1, %v3730_v2, %v387_v3  ;;  %v561_v16 = vrot.slane %v283_v44, 2  ;;  %v3754_v17 = vrot.slane %v3700_v49, 2  ;;  %v290_v3 = vld [vmem:[%s3627_s22 + $0x68] sm:$0xff] }
  0x24   : > { %3051 = vrot.lane.b32.xlu0 %v3050_v57, %s3576_s24  ;;  %v3751_v15 = vsel %vm373_vm1, %v424_v5, %v3736_v6  ;;  %v564_v23 = vrot.slane %v285_v50, 2  ;;  %v601_v24 = vrot.slane %v3711_v55, 2  ;;  %v3762_v27 = vrot.slane %v3714_v56, 2  ;;  %v3880_v56 = vld [vmem:[%s3627_s22 + $0x90] sm:$0xff] }
  0x25   : > { %v428_v22 = vsel %vm373_vm1, %v3736_v6, %v427_v12  ;;  %v604_v28 = vrot.slane %v309_v61, 2  ;;  %v389_v29 = vrot.slane %v286_v13, 1  ;;  %v3075_v33 = vpack.i.bf16 %v388_v14, %v3743_v11  ;;  %v314_v12 = vld [vmem:[%s3627_s22 + $0x128] sm:$0xff] }
  0x26   : > { %3066 = vrot.lane.b32.xlu1 %v3065_v9, %s3575_s23  ;;  %v3769_v35 = vrot.slane %v287_v20, 1  ;;  %v392_v36 = vrot.slane %v288_v21, 1  ;;  %v3070_v37 = vpack.i.bf16 %v428_v22, %v3751_v15  ;;  %v3775_v38 = vsel %vm550_vm0, %v561_v16, %v3754_v17  ;;  %v291_v9 = vld [vmem:[%s3627_s22 + $0x70] sm:$0x3] }
  0x27   : > { %v565_v40 = vsel %vm550_vm0, %v3754_v17, %v564_v23  ;;  %v3781_v42 = vsel %vm550_vm0, %v601_v24, %v3762_v27  ;;  %v605_v43 = vsel %vm550_vm0, %v3762_v27, %v604_v28  ;;  %v429_v44 = vrot.slane %v310_v30, 1 }
  0x28   : > { %3061 = vrot.lane.b32.xlu0 %v3060_v10, %s3575_s23  ;;  %v3785_v45 = vrot.slane %v311_v31, 1  ;;  %v432_v47 = vrot.slane %v312_v32, 1  ;;  %v3789_v50 = vsel %vm373_vm1, %v389_v29, %v3769_v35  ;;  %v393_v51 = vsel %vm373_vm1, %v3769_v35, %v392_v36  ;;  %v313_v10 = vld [vmem:[%s3627_s22 + $0x120] sm:$0xff] }
  0x29   : > { %v566_v52 = vrot.slane %v286_v13, 2  ;;  %v3793_v53 = vrot.slane %v287_v20, 2  ;;  %v3085_v57 = vpack.i.bf16 %v565_v40, %v3775_v38  ;;  %v569_v59 = vrot.slane %v288_v21, 2  ;;  %v315_v21 = vld [vmem:[%s3627_s22 + $0x130] sm:$0x3] }
  0x2a   : > { %3076 = vrot.lane.b32.xlu1 %v3075_v33, %s3576_s24  ;;  %v606_v60 = vrot.slane %v310_v30, 2  ;;  %v3797_v61 = vrot.slane %v311_v31, 2  ;;  %v3080_v4 = vpack.i.bf16 %v605_v43, %v3781_v42  ;;  %v609_v5 = vrot.slane %v312_v32, 2  ;;  %v292_v33 = vld [vmem:[%s3627_s22 + $0x78] sm:$0xff] }
  0x2b   : > { %v3095_v13 = vpack.i.bf16 %v393_v51, %v3789_v50  ;;  %v3809_v14 = vsel %vm373_vm1, %v429_v44, %v3785_v45  ;;  %v433_v16 = vsel %vm373_vm1, %v3785_v45, %v432_v47  ;;  %v3815_v20 = vsel %vm550_vm0, %v566_v52, %v3793_v53  ;;  %v293_v44 = vld [vmem:[%s3627_s22 + $0x80] sm:$0xff]  ;;  %v294_v47 = vld [vmem:[%s3627_s22 + $0x88] sm:$0x3] }
  0x2c   : > { %3071 = vrot.lane.b32.xlu0 %v3070_v37, %s3576_s24  ;;  %v570_v22 = vsel %vm550_vm0, %v3793_v53, %v569_v59  ;;  %v3822_v23 = vsel %vm550_vm0, %v606_v60, %v3797_v61  ;;  %v394_v24 = vrot.slane %v289_v62, 1  ;;  %v3824_v28 = vrot.slane %v290_v3, 1 }
  0x2d   : > { %v610_v29 = vsel %vm550_vm0, %v3797_v61, %v609_v5  ;;  %v397_v30 = vrot.slane %v291_v9, 1  ;;  %v434_v31 = vrot.slane %v313_v10, 1  ;;  %v3829_v32 = vrot.slane %v314_v12, 1 }
  0x2e   : > { %3086 = vrot.lane.b32.xlu1 %v3085_v57, %s3575_s23  ;;  %v3090_v36 = vpack.i.bf16 %v433_v16, %v3809_v14  ;;  %v437_v37 = vrot.slane %v315_v21, 1  ;;  %v571_v40 = vrot.slane %v289_v62, 2  ;;  %v3834_v43 = vrot.slane %v290_v3, 2  ;;  %v316_v62 = vld [vmem:[%s3627_s22 + $0x138] sm:$0xff]  ;;  %v317_v3 = vld [vmem:[%s3627_s22 + $0x140] sm:$0xff] }
  0x2f   : > { %v3105_v51 = vpack.i.bf16 %v570_v22, %v3815_v20  ;;  %v574_v52 = vrot.slane %v291_v9, 2  ;;  %v611_v57 = vrot.slane %v313_v10, 2  ;;  %v3839_v59 = vrot.slane %v314_v12, 2 }
  0x30   : > { %3081 = vrot.lane.b32.xlu0 %v3080_v4, %s3575_s23  ;;  %5358 = vst [vmem:[#allocation13_spill] sm:$0xff] %v3834_v43  ;;  %v3100_v60 = vpack.i.bf16 %v610_v29, %v3822_v23  ;;  %v3844_v4 = vsel %vm373_vm1, %v394_v24, %v3824_v28  ;;  %v614_v5 = vrot.slane %v315_v21, 2  ;;  %v399_v16 = vrot.slane %v292_v33, 1  ;;  %v318_v24 = vld [vmem:[%s3627_s22 + $0x148] sm:$0x3] }
  0x31   : > { %v398_v22 = vsel %vm373_vm1, %v3824_v28, %v397_v30  ;;  %v3853_v9 = vsel %vm373_vm1, %v434_v31, %v3829_v32  ;;  %v3855_v10 = vrot.slane %v293_v44, 1  ;;  %v402_v12 = vrot.slane %v294_v47, 1 }
  0x32   : > { %3096 = vrot.lane.b32.xlu1 %v3095_v13, %s3576_s24  ;;  %5359 = vst [vmem:[#allocation14_spill] sm:$0xff] %v3853_v9  ;;  %v438_v21 = vsel %vm373_vm1, %v3829_v32, %v437_v37  ;;  %v3863_v13 = vsel %vm550_vm0, %v571_v40, %v3834_v43  ;;  %v575_v29 = vsel %vm550_vm0, %v3834_v43, %v574_v52  ;;  %v439_v55 = vrot.slane %v316_v62, 1  ;;  %v324_v43 = vld [vmem:[%s3627_s22 + $0x178] sm:$0x3] }
  0x33   : > { %5360 = vst [vmem:[#allocation15_spill] sm:$0xff] %v3855_v10  ;;  %5361 = vst [vmem:[#allocation16_spill] sm:$0xff] %v3863_v13  ;;  %v3869_v30 = vsel %vm550_vm0, %v611_v57, %v3839_v59  ;;  %v615_v31 = vsel %vm550_vm0, %v3839_v59, %v614_v5  ;;  %v3877_v37 = vrot.slane %v317_v3, 1  ;;  %v3884_v40 = vsel %vm373_vm1, %v3855_v10, %v402_v12  ;;  %v296_v5 = vld [vmem:[%s3627_s22 + $0x98] sm:$0xff] }
  0x34   : > { %3091 = vrot.lane.b32.xlu0 %v3090_v36, %s3576_s24  ;;  %v3875_v36 = vsel %vm373_vm1, %v399_v16, %v3855_v10  ;;  %v442_v52 = vrot.slane %v318_v24, 1  ;;  %v576_v57 = vrot.slane %v292_v33, 2  ;;  %v3886_v49 = vrot.slane %v293_v44, 2 }
  0x35   : > { %5362 = vst [vmem:[#allocation17_spill] sm:$0xff] %v3875_v36  ;;  %5363 = vst [vmem:[#allocation18_spill] sm:$0xff] %v3877_v37  ;;  %v3115_v16 = vpack.i.bf16 %v398_v22, %v3844_v4  ;;  %v579_v26 = vrot.slane %v294_v47, 2  ;;  %v616_v18 = vrot.slane %v316_v62, 2  ;;  %v3892_v19 = vrot.slane %v317_v3, 2 }
  0x36   : > { %5364 = vst [vmem:[#allocation19_spill] sm:$0xff] %v3886_v49  ;;  %3106 = vrot.lane.b32.xlu1 %v3105_v51, %s3575_s23  ;;  %v3110_v12 = vpack.i.bf16 %v438_v21, %v3853_v9  ;;  %v3125_v7 = vpack.i.bf16 %v575_v29, %v3863_v13  ;;  %v619_v33 = vrot.slane %v318_v24, 2  ;;  %v404_v44 = vrot.slane %v3880_v56, 1  ;;  %v321_v22 = vld [vmem:[%s3627_s22 + $0x160] sm:$0x3] }
  0x37   : > { %5365 = vst [vmem:[#allocation20_spill] sm:$0xff] %v3892_v19  ;;  %v3120_v51 = vpack.i.bf16 %v615_v31, %v3869_v30  ;;  %v3135_v47 = vpack.i.bf16 %v3884_v40, %v3875_v36  ;;  %v3903_v62 = vrot.slane %v296_v5, 1  ;;  %v407_v3 = vrot.slane %v297_v25, 1 }
  0x38   : > { %3101 = vrot.lane.b32.xlu0 %v3100_v60, %s3575_s23  ;;  %v3908_v60 = vsel %vm373_vm1, %v439_v55, %v3877_v37  ;;  %v443_v24 = vsel %vm373_vm1, %v3877_v37, %v442_v52  ;;  %v3914_v21 = vsel %vm550_vm0, %v576_v57, %v3886_v49  ;;  %v3918_v29 = vsel %vm550_vm0, %v3886_v49, %v579_v26  ;;  %v298_v57 = vld [vmem:[%s3627_s22 + $0xa8] sm:$0xff]  ;;  %v300_v49 = vld [vmem:[%s3627_s22 + $0xb8] sm:$0x3]  ;;  %v323_v37 = vld [vmem:[%s3627_s22 + $0x170] sm:$0xff] }
  0x39   : > { %5366 = vst [vmem:[#allocation21_spill] sm:$0xff] %v3903_v62  ;;  %5367 = vst [vmem:[#allocation22_spill] sm:$0xff] %v3908_v60  ;;  %v3923_v31 = vsel %vm550_vm0, %v616_v18, %v3892_v19  ;;  %v3927_v55 = vsel %vm550_vm0, %v3892_v19, %v619_v33  ;;  %v444_v40 = vrot.slane %v319_v8, 1  ;;  %v3929_v52 = vrot.slane %v320_v1, 1 }
  0x3a   : > { %5368 = vst [vmem:[#allocation23_spill] sm:$0xff] %v3914_v21  ;;  %3116 = vrot.lane.b32.xlu1 %v3115_v16, %s3576_s24  ;;  %5369 = vst [vmem:[#allocation24_spill] sm:$0xff] %v3923_v31  ;;  %v3935_v26 = vsel %vm373_vm1, %v404_v44, %v3903_v62  ;;  %v3939_v18 = vsel %vm373_vm1, %v3903_v62, %v407_v3  ;;  %v447_v16 = vrot.slane %v321_v22, 1  ;;  %v581_v33 = vrot.slane %v3880_v56, 2 }
  0x3b   : > { %5370 = vst [vmem:[#allocation25_spill] sm:$0xff] %v3929_v52  ;;  %5371 = vst [vmem:[#allocation26_spill] sm:$0xff] %v3935_v26  ;;  %v3944_v36 = vrot.slane %v296_v5, 2  ;;  %v584_v10 = vrot.slane %v297_v25, 2  ;;  %v621_v19 = vrot.slane %v319_v8, 2  ;;  %v3946_v9 = vrot.slane %v320_v1, 2 }
  0x3c   : > { %3111 = vrot.lane.b32.xlu0 %v3110_v12, %s3576_s24  ;;  %v322_v12 = vld [vmem:[%s3627_s22 + $0x168] sm:$0xff]  ;;  %v3130_v44 = vpack.i.bf16 %v443_v24, %v3908_v60  ;;  %v3145_v13 = vpack.i.bf16 %v3918_v29, %v3914_v21  ;;  %v624_v3 = vrot.slane %v321_v22, 2  ;;  %v409_v62 = vrot.slane %v298_v57, 1 }
  0x3d   : > { %5372 = vst [vmem:[#allocation27_spill] sm:$0xff] %v3944_v36  ;;  %v3140_v56 = vpack.i.bf16 %v3927_v55, %v3923_v31  ;;  %v3155_v1 = vpack.i.bf16 %v3939_v18, %v3935_v26  ;;  %v410_v8 = vrot.slane %v299_v0, 1  ;;  %v412_v25 = vrot.slane %v300_v49, 1  ;;  %v2692_v18 = vld [vmem:[%s3627_s22 + $0x100] sm:$0x3] }
  0x3e   : > { %3126 = vrot.lane.b32.xlu1 %v3125_v7, %s3575_s23  ;;  %v3962_v5 = vsel %vm373_vm1, %v444_v40, %v3929_v52  ;;  %v448_v22 = vsel %vm373_vm1, %v3929_v52, %v447_v16  ;;  %v449_v24 = vrot.slane %v322_v12, 1  ;;  %v3966_v7 = vrot.slane %v323_v37, 1  ;;  %v2577_v21 = vld [vmem:[%s3627_s22 + $0xe8] sm:$0x3] }
  0x3f   : > { %v3970_v29 = vsel %vm550_vm0, %v581_v33, %v3944_v36  ;;  %v3974_v55 = vsel %vm550_vm0, %v3944_v36, %v584_v10  ;;  %v452_v40 = vrot.slane %v324_v43, 1  ;;  %v3983_v16 = vsel %vm550_vm0, %v3946_v9, %v624_v3  ;;  %v2553_v60 = vld [vmem:[%s3627_s22 + $0x28] sm:$0x3] }
  0x40   : > { %3121 = vrot.lane.b32.xlu0 %v3120_v51, %s3575_s23  ;;  %v3978_v51 = vsel %vm550_vm0, %v621_v19, %v3946_v9  ;;  %v3986_v26 = vsel %vm373_vm1, %v409_v62, %v410_v8  ;;  %v586_v52 = vrot.slane %v298_v57, 2  ;;  %v587_v33 = vrot.slane %v299_v0, 2 }
  0x41   : > { %v3991_v10 = vsel %vm373_vm1, %v410_v8, %v412_v25  ;;  %v589_v36 = vrot.slane %v300_v49, 2  ;;  %v626_v19 = vrot.slane %v322_v12, 2  ;;  %v3993_v31 = vrot.slane %v323_v37, 2 }
  0x42   : > { %3136 = vrot.lane.b32.xlu1 %v3135_v47, %s3576_s24  ;;  %v3999_v62 = vsel %vm373_vm1, %v449_v24, %v3966_v7  ;;  %v4003_v0 = vsel %vm373_vm1, %v3966_v7, %v452_v40  ;;  %v629_v47 = vrot.slane %v324_v43, 2  ;;  %v1790_v57 = vrot.slane %v2692_v18, 1  ;;  %v2668_v43 = vld [vmem:[%s3627_s22 + $0x40] sm:$0x3] }
  0x43   : > { %v4006_v49 = vsel %vm550_vm0, %v586_v52, %v587_v33  ;;  %v4009_v37 = vsel %vm550_vm0, %v587_v33, %v589_v36  ;;  %v934_v12 = vrot.slane %v2577_v21, 1  ;;  %v1110_v3 = vrot.slane %v2577_v21, 2  ;;  %v2586_v36 = vld [vmem:[%s3627_s22 + $0x130] sm:$0x3] }
  0x44   : > { %3131 = vrot.lane.b32.xlu0 %v3130_v44, %s3576_s24  ;;  %v3150_v44 = vpack.i.bf16 %v448_v22, %v3962_v5  ;;  %v3165_v8 = vpack.i.bf16 %v3974_v55, %v3970_v29  ;;  %v3160_v25 = vpack.i.bf16 %v3983_v16, %v3978_v51  ;;  %v894_v24 = vrot.slane %v2553_v60, 1  ;;  %v2580_v55 = vld [vmem:[%s3627_s22 + $0x100] sm:$0x3] }
  0x45   : > { %v3175_v52 = vpack.i.bf16 %v3991_v10, %v3986_v26  ;;  %v4024_v21 = vsel %vm550_vm0, %v626_v19, %v3993_v31  ;;  %v4028_v22 = vsel %vm550_vm0, %v3993_v31, %v629_v47  ;;  %v4036_v26 = vsel %vm373_vm1, %v3736_v6, %v1790_v57  ;;  %v4051_v47 = vld [vmem:[%s3627_s22 + $0x118] sm:$0x3] }
  0x46   : > { %3146 = vrot.lane.b32.xlu1 %v3145_v13, %s3575_s23  ;;  %v4040_v40 = vsel %vm373_vm1, %v3681_v39, %v934_v12  ;;  %v1966_v16 = vrot.slane %v2692_v18, 2  ;;  %v4044_v33 = vsel %vm550_vm0, %v3708_v54, %v1110_v3  ;;  %v1750_v10 = vrot.slane %v2668_v43, 1  ;;  %v2556_v13 = vld [vmem:[%s3627_s22 + $0x40] sm:$0x3] }
  0x47   : > { %v1070_v19 = vrot.slane %v2553_v60, 2  ;;  %v1926_v39 = vrot.slane %v2668_v43, 2  ;;  %v939_v12 = vrot.slane %v2580_v55, 1  ;;  %v1115_v18 = vrot.slane %v2580_v55, 2  ;;  %v2583_v43 = vld [vmem:[%s3627_s22 + $0x118] sm:$0x3] }
  0x48   : > { %3141 = vrot.lane.b32.xlu0 %v3140_v56, %s3575_s23  ;;  %v4048_v56 = vsel %vm373_vm1, %v3674_v34, %v894_v24  ;;  %v4063_v60 = vsel %vm550_vm0, %v3762_v27, %v1966_v16  ;;  %v2671_v24 = vld [vmem:[%s3627_s22 + $0x58] sm:$0x3]  ;;  %v1795_v34 = vrot.slane %v4051_v47, 1  ;;  %v2698_v16 = vld [vmem:[%s3627_s22 + $0x130] sm:$0x3]  ;;  %v4081_v54 = vsel %vm373_vm1, %v3730_v2, %v1750_v10 }
  0x49   : > { %v4067_v3 = vsel %vm550_vm0, %v3697_v48, %v1070_v19  ;;  %v4085_v48 = vsel %vm373_vm1, %v3736_v6, %v939_v12  ;;  %v899_v19 = vrot.slane %v2556_v13, 1  ;;  %v1755_v57 = vrot.slane %v2671_v24, 1  ;;  %v2674_v10 = vld [vmem:[%s3627_s22 + $0x70] sm:$0x3] }
  0x4a   : > { %3156 = vrot.lane.b32.xlu1 %v3155_v1, %s3576_s24  ;;  %v4096_v1 = vsel %vm550_vm0, %v3754_v17, %v1926_v39  ;;  %v1075_v12 = vrot.slane %v2556_v13, 2  ;;  %v944_v55 = vrot.slane %v2583_v43, 1  ;;  %v1120_v39 = vrot.slane %v2583_v43, 2 }
  0x4b   : > { %v4103_v6 = vsel %vm373_vm1, %v3730_v2, %v899_v19  ;;  %v2559_v2 = vld [vmem:[%s3627_s22 + $0x58] sm:$0x3]  ;;  %v949_v43 = vrot.slane %v2586_v36, 1 }
  0x4c   : > { %3151 = vrot.lane.b32.xlu0 %v3150_v44, %s3576_s24  ;;  %v4089_v44 = vsel %vm550_vm0, %v3762_v27, %v1115_v18  ;;  %v1931_v27 = vrot.slane %v2671_v24, 2  ;;  %v1800_v18 = vrot.slane %v2698_v16, 1  ;;  %v4125_v19 = vsel %vm550_vm0, %v3754_v17, %v1075_v12  ;;  %v2589_v12 = vld [vmem:[%s3627_s22 + $0x148] sm:$0x3] }
  0x4d   : > { %5374 = vst [vmem:[#allocation29_spill] sm:$0xff] %v4125_v19  ;;  %v4138_v24 = vsel %vm373_vm1, %v3785_v45, %v944_v55  ;;  %v4145_v17 = vsel %vm373_vm1, %v3785_v45, %v1795_v34  ;;  %v1976_v55 = vrot.slane %v2698_v16, 2  ;;  %v1760_v19 = vrot.slane %v2674_v10, 1 }
  0x4e   : > { %3166 = vrot.lane.b32.xlu1 %v3165_v8, %s3575_s23  ;;  %v4112_v8 = vsel %vm373_vm1, %v3769_v35, %v1755_v57  ;;  %v4134_v13 = vsel %vm373_vm1, %v3829_v32, %v1800_v18  ;;  %v904_v57 = vrot.slane %v2559_v2, 1  ;;  %v5376_v18 = vpack.i.bf16 %v4003_v0, %v3999_v62  ;;  %v2677_v0 = vld [vmem:[%s3627_s22 + $0x88] sm:$0x3] }
  0x4f   : > { %5375 = vst [vmem:[#allocation30_spill] sm:$0xff] %v4134_v13  ;;  %v1936_v13 = vrot.slane %v2674_v10, 2  ;;  %v4155_v45 = vsel %vm550_vm0, %v3797_v61, %v1120_v39  ;;  %v4167_v16 = vsel %vm550_vm0, %v3839_v59, %v1976_v55  ;;  %v4171_v10 = vsel %vm373_vm1, %v3824_v28, %v1760_v19 }
  0x50   : > { %3161 = vrot.lane.b32.xlu0 %v3160_v25, %s3575_s23  ;;  %v4121_v25 = vsel %vm550_vm0, %v3793_v53, %v1931_v27  ;;  %v2701_v27 = vld [vmem:[%s3627_s22 + $0x148] sm:$0x3]  ;;  %5378 = vst [vmem:[#allocation32_spill] sm:$0xff] %v4167_v16  ;;  %5379 = vst [vmem:[#allocation33_spill] sm:$0xff] %v4171_v10  ;;  %v5380_v39 = vpack.i.bf16 %v4009_v37, %v4006_v49  ;;  %v5384_v49 = vpack.i.bf16 %v4028_v22, %v4024_v21  ;;  %v5385_v37 = vld [vmem:[#allocation16_spill] sm:$0xff] }
  0x51   : > { %5373 = vst [vmem:[#allocation28_spill] sm:$0xff] %v4121_v25  ;;  %v1080_v25 = vrot.slane %v2559_v2, 2  ;;  %v1805_v34 = vrot.slane %v2701_v27, 1  ;;  %v5386_v2 = vld [vmem:[#allocation18_spill] sm:$0xff]  ;;  %v954_v22 = vrot.slane %v2589_v12, 1 }
  0x52   : > { %3176 = vrot.lane.b32.xlu1 %v3175_v52, %s3576_s24  ;;  %v4159_v52 = vsel %vm373_vm1, %v3769_v35, %v904_v57  ;;  %v2562_v35 = vld [vmem:[%s3627_s22 + $0x70] sm:$0x3]  ;;  %v5389_v10 = vld [vmem:[#allocation22_spill] sm:$0xff]  ;;  %v1981_v57 = vrot.slane %v2701_v27, 2  ;;  %v5394_v27 = vpack.i.bf16 %v4040_v40, %v3693_v46  ;;  %v5399_v40 = vld [vmem:[#allocation17_spill] sm:$0xff] }
  0x53   : > { %5377 = vst [vmem:[#allocation31_spill] sm:$0xff] %v4159_v52  ;;  %v4188_v19 = vsel %vm550_vm0, %v3793_v53, %v1080_v25  ;;  %v4205_v53 = vsel %vm373_vm1, %v3829_v32, %v949_v43  ;;  %v2704_v25 = vld [vmem:[%s3627_s22 + $0x160] sm:$0x3]  ;;  %v1941_v52 = vrot.slane %v2677_v0, 2  ;;  %v5391_v32 = vpack.i.bf16 %v4036_v26, %v3751_v15 }
  0x54   : > { %3171 = vrot.lane.b32.xlu0 %v5376_v18, %s3576_s24  ;;  %v5381_v18 = vld [vmem:[#allocation13_spill] sm:$0xff]  ;;  %5383 = vst [vmem:[#allocation34_spill] sm:$0xff] %v4188_v19  ;;  %5388 = vst [vmem:[#allocation18_spill] sm:$0xff] %v4205_v53  ;;  %v1765_v19 = vrot.slane %v2677_v0, 1  ;;  %v5395_v0 = vld [vmem:[#allocation20_spill] sm:$0xff] }
  0x55   : > { %v4184_v55 = vsel %vm550_vm0, %v5381_v18, %v1936_v13  ;;  %v4201_v13 = vsel %vm373_vm1, %v5386_v2, %v1805_v34  ;;  %v1085_v34 = vrot.slane %v2562_v35, 2  ;;  %v5400_v53 = vld [vmem:[#allocation19_spill] sm:$0xff] }
  0x56   : > { %3186 = vrot.lane.b32.xlu1 %v5380_v39, %s3575_s23  ;;  %5382 = vst [vmem:[#allocation13_spill] sm:$0xff] %v4184_v55  ;;  %5387 = vst [vmem:[#allocation16_spill] sm:$0xff] %v4201_v13  ;;  %v1125_v39 = vrot.slane %v2586_v36, 2  ;;  %v909_v55 = vrot.slane %v2562_v35, 1  ;;  %v1810_v36 = vrot.slane %v2704_v25, 1  ;;  %v4235_v35 = vsel %vm550_vm0, %v5395_v0, %v1981_v57  ;;  %v5404_v13 = vld [vmem:[#allocation25_spill] sm:$0xff] }
  0x57   : > { %v4248_v26 = vsel %vm550_vm0, %v5400_v53, %v1941_v52  ;;  %v2680_v57 = vld [vmem:[%s3627_s22 + $0xa0] sm:$0x3]  ;;  %v2707_v52 = vld [vmem:[%s3627_s22 + $0x178] sm:$0x3] }
  0x58   : > { %3181 = vrot.lane.b32.xlu0 %v5384_v49, %s3575_s23  ;;  %v5390_v49 = vld [vmem:[#allocation14_spill] sm:$0xff]  ;;  %v4219_v43 = vsel %vm550_vm0, %v3839_v59, %v1125_v39  ;;  %v4223_v16 = vsel %vm373_vm1, %v3824_v28, %v909_v55  ;;  %v5396_v28 = vld [vmem:[#allocation15_spill] sm:$0xff]  ;;  %v4252_v59 = vsel %vm550_vm0, %v5381_v18, %v1085_v34  ;;  %v4261_v46 = vsel %vm373_vm1, %v5404_v13, %v1810_v36 }
  0x59   : > { %5392 = vst [vmem:[#allocation22_spill] sm:$0xff] %v4219_v43  ;;  %5393 = vst [vmem:[#allocation14_spill] sm:$0xff] %v4223_v16  ;;  %v4239_v55 = vsel %vm373_vm1, %v5396_v28, %v1765_v19  ;;  %v2565_v39 = vld [vmem:[%s3627_s22 + $0x88] sm:$0x3]  ;;  %v4272_v18 = vld [vmem:[%s5289_s1] sm:$0xff]  ;;  %v5406_v34 = vpack.i.bf16 %v4044_v33, %v3727_v63  ;;  %v5407_v19 = vpack.i.bf16 %v4048_v56, %v3685_v41  ;;  %v1946_v63 = vrot.slane %v2680_v57, 2 }
  0x5a   : > { %3196 = vrot.lane.b32.xlu1 %v5391_v32, %s3576_s24  ;;  %5397 = vst [vmem:[#allocation20_spill] sm:$0xff] %v4239_v55  ;;  %v5398_v32 = vld [vmem:[#allocation24_spill] sm:$0xff]  ;;  %5401 = vst [vmem:[#allocation15_spill] sm:$0xff] %v4248_v26  ;;  %v5403_v16 = vld [vmem:[#allocation23_spill] sm:$0xff]  ;;  %2818 = vmatprep.mubr.msk.f32.mxu0 %vm1309_vm2, %v4272_v18  ;;  %v1770_v26 = vrot.slane %v2680_v57, 1  ;;  %v1090_v33 = vrot.slane %v2565_v39, 2 }
  0x5b   : > { %5402 = vst [vmem:[#allocation24_spill] sm:$0xff] %v4252_v59  ;;  %v2592_v55 = vld [vmem:[%s3627_s22 + $0x160] sm:$0x3]  ;;  %5405 = vst [vmem:[#allocation17_spill] sm:$0xff] %v4272_v18  ;;  %v1986_v59 = vrot.slane %v2704_v25, 2  ;;  %v1815_v43 = vrot.slane %v2707_v52, 1 }
  0x5c   : > { %3191 = vrot.lane.b32.xlu0 %v5394_v27, %s3576_s24  ;;  %v4265_v27 = vsel %vm373_vm1, %v5386_v2, %v954_v22  ;;  %v1130_v2 = vrot.slane %v2589_v12, 2  ;;  %v914_v22 = vrot.slane %v2565_v39, 1  ;;  %v959_v36 = vrot.slane %v2592_v55, 1  ;;  %v5408_v25 = vld [vmem:[#allocation21_spill] sm:$0xff]  ;;  %v5410_v57 = vld [vmem:[#allocation26_spill] sm:$0xff] }
  0x5d   : > { %v4302_v56 = vsel %vm550_vm0, %v3946_v9, %v1986_v59  ;;  %v4322_v59 = vsel %vm550_vm0, %v5400_v53, %v1090_v33  ;;  %v1135_v33 = vrot.slane %v2592_v55, 2  ;;  %v1971_v55 = vrot.slane %v4051_v47, 2 }
  0x5e   : > { %3206 = vrot.lane.b32.xlu1 %v5406_v34, %s3575_s23  ;;  %v4290_v34 = vsel %vm550_vm0, %v5395_v0, %v1130_v2  ;;  %v4294_v12 = vsel %vm373_vm1, %v5396_v28, %v914_v22  ;;  %v4306_v0 = vsel %vm373_vm1, %v5408_v25, %v1770_v26  ;;  %v5409_v28 = vpack.i.bf16 %v4063_v60, %v3781_v42  ;;  %v5411_v2 = vld [vmem:[#allocation27_spill] sm:$0xff] }
  0x5f   : > { %v3365_v18 = vpack.i.bf16 %v4290_v34, %v5398_v32  ;;  %v3360_v41 = vpack.i.bf16 %v4294_v12, %v5399_v40  ;;  %v3375_v39 = vpack.i.bf16 %v4302_v56, %v3978_v51  ;;  %v4318_v22 = vsel %vm550_vm0, %v5411_v2, %v1946_v63 }
  0x60   : > { %3201 = vrot.lane.b32.xlu0 %v5407_v19, %s3576_s24  ;;  %v3370_v19 = vpack.i.bf16 %v4306_v0, %v5410_v57  ;;  %v5412_v26 = vpack.i.bf16 %v4081_v54, %v3743_v11  ;;  %v3385_v60 = vpack.i.bf16 %v4318_v22, %v3970_v29  ;;  %v3380_v25 = vpack.i.bf16 %v4322_v59, %v5403_v16 }
  0x61   : > { %v4338_v63 = vsel %vm373_vm1, %v5404_v13, %v959_v36  ;;  %v1991_v2 = vrot.slane %v2707_v52, 2  ;;  %v4352_v13 = vsel %vm550_vm0, %v3946_v9, %v1135_v33  ;;  %v3245_v9 = vpack.i.bf16 %v4089_v44, %v3781_v42  ;;  %v5421_v36 = vld [vmem:[#allocation29_spill] sm:$0xff]  ;;  %v5425_v33 = vld [vmem:[#allocation31_spill] sm:$0xff] }
  0x62   : > { %3216 = vrot.lane.b32.xlu1 %v5409_v28, %s3575_s23  ;;  %v4334_v28 = vsel %vm373_vm1, %v3966_v7, %v1815_v43  ;;  %v3390_v54 = vpack.i.bf16 %v4338_v63, %v3962_v5  ;;  %v3235_v7 = vpack.i.bf16 %v4145_v17, %v3809_v14  ;;  %v5414_v43 = vpack.i.bf16 %v4067_v3, %v3720_v58  ;;  %v4697_v63 = vld [vmem:[%s3627_s22 + $0xc0] sm:$0xff] }
  0x63   : > { %v3395_v53 = vpack.i.bf16 %v4334_v28, %v3999_v62  ;;  %v3405_v52 = vpack.i.bf16 %v4352_v13, %v3978_v51  ;;  %v5415_v58 = vpack.i.bf16 %v4085_v48, %v3751_v15  ;;  %v1972_v47 = vsel %vm550_vm0, %v3797_v61, %v1971_v55  ;;  %v5418_v15 = vld [vmem:[#allocation28_spill] sm:$0xff]  ;;  %v5420_v48 = vld [vmem:[#allocation30_spill] sm:$0xff] }
  0x64   : > { %3211 = vrot.lane.b32.xlu0 %v5412_v26, %s3576_s24  ;;  %v5413_v26 = vpack.i.bf16 %v4096_v1, %v3775_v38  ;;  %v4363_v1 = vsel %vm550_vm0, %v3993_v31, %v1991_v2  ;;  %v3255_v31 = vpack.i.bf16 %v1972_v47, %v3822_v23  ;;  %v5416_v3 = vpack.i.bf16 %v4103_v6, %v3743_v11 }
  0x65   : > { %v3415_v17 = vpack.i.bf16 %v4363_v1, %v4024_v21  ;;  %v5417_v42 = vpack.i.bf16 %v4112_v8, %v3789_v50  ;;  %v5419_v61 = vpack.i.bf16 %v5418_v15, %v3815_v20  ;;  %v3275_v44 = vpack.i.bf16 %v5420_v48, %v5390_v49 }
  0x66   : > { %3226 = vrot.lane.b32.xlu1 %v5413_v26, %s3575_s23  ;;  %v5422_v11 = vpack.i.bf16 %v5421_v36, %v3775_v38  ;;  %v5423_v6 = vpack.i.bf16 %v4138_v24, %v3809_v14  ;;  %v5424_v8 = vpack.i.bf16 %v4155_v45, %v3822_v23  ;;  %v5426_v2 = vpack.i.bf16 %v5425_v33, %v3789_v50  ;;  %v5427_v38 = vld [vmem:[#allocation32_spill] sm:$0xff]  ;;  %v5431_v24 = vld [vmem:[#allocation13_spill] sm:$0xff]  ;;  %v5433_v45 = vld [vmem:[#allocation34_spill] sm:$0xff] }
  0x67   : > { %v5428_v26 = vpack.i.bf16 %v5427_v38, %v3869_v30  ;;  %v5432_v23 = vpack.i.bf16 %v5431_v24, %v5385_v37  ;;  %v5434_v50 = vpack.i.bf16 %v5433_v45, %v3815_v20  ;;  %v4458_v24 = vld [vmem:[%s3627_s22 + $0x98] sm:$0xff] }
  0x68   : > { %3221 = vrot.lane.b32.xlu0 %v5414_v43, %s3575_s23  ;;  %v5435_v43 = vld [vmem:[#allocation16_spill] sm:$0xff] }
  0x69   : > { %v5436_v55 = vpack.i.bf16 %v5435_v43, %v5389_v10 }
  0x6a   : > { %3236 = vrot.lane.b32.xlu1 %v3235_v7, %s3576_s24  ;;  %v5429_v7 = vld [vmem:[#allocation33_spill] sm:$0xff] }
  0x6b   : > { %v5430_v14 = vpack.i.bf16 %v5429_v7, %v3844_v4 }
  0x6c   : > { %3231 = vrot.lane.b32.xlu0 %v5415_v58, %s3576_s24 }
  0x6e   : > { %3246 = vrot.lane.b32.xlu1 %v3245_v9, %s3575_s23  ;;  %v5437_v9 = vld [vmem:[#allocation18_spill] sm:$0xff] }
  0x6f   : > { %v5438_v58 = vpack.i.bf16 %v5437_v9, %v5390_v49  ;;  %v5448_v9 = vld [vmem:[#allocation20_spill] sm:$0xff] }
  0x70   : > { %3241 = vrot.lane.b32.xlu0 %v5416_v3, %s3576_s24 }
  0x72   : > { %3256 = vrot.lane.b32.xlu1 %v3255_v31, %s3575_s23 }
  0x74   : > { %3251 = vrot.lane.b32.xlu0 %v5417_v42, %s3576_s24 }
  0x76   : > { %3266 = vrot.lane.b32.xlu1 %v5419_v61, %s3575_s23  ;;  %v5439_v61 = vld [vmem:[#allocation22_spill] sm:$0xff] }
  0x77   : > { %v5440_v48 = vpack.i.bf16 %v5439_v61, %v3869_v30  ;;  %v4480_v61 = vld [vmem:[%s3627_s22 + $0xa8] sm:$0xff] }
  0x78   : > { %3261 = vrot.lane.b32.xlu0 %v5422_v11, %s3575_s23  ;;  %v5443_v11 = vld [vmem:[#allocation2_spill] sm:$0xff] }
  0x7a   : > { %3276 = vrot.lane.b32.xlu1 %v3275_v44, %s3576_s24  ;;  %v5441_v44 = vld [vmem:[#allocation14_spill] sm:$0xff] }
  0x7b   : > { %v5442_v49 = vpack.i.bf16 %v5441_v44, %v3844_v4 }
  0x7c   : > { %3271 = vrot.lane.b32.xlu0 %v5423_v6, %s3576_s24 }
  0x7e   : > { %3286 = vrot.lane.b32.xlu1 %v5424_v8, %s3575_s23  ;;  %v5444_v8 = vld [vmem:[#allocation3_spill] sm:$0xff] }
  0x80   : > { %3281 = vrot.lane.b32.xlu0 %v5426_v2, %s3576_s24 }
  0x82   : > { %3296 = vrot.lane.b32.xlu1 %v5428_v26, %s3575_s23 }
  0x84   : > { %3291 = vrot.lane.b32.xlu0 %v5430_v14, %s3576_s24  ;;  %v4455_v14 = vld [vmem:[%s3627_s22 + $0x90] sm:$0xff] }
  0x86   : > { %3306 = vrot.lane.b32.xlu1 %v5432_v23, %s3575_s23 }
  0x88   : > { %3301 = vrot.lane.b32.xlu0 %v5434_v50, %s3575_s23  ;;  %v5447_v50 = vpack.i.bf16 %v4235_v35, %v5398_v32 }
  0x8a   : > { %3316 = vrot.lane.b32.xlu1 %v5436_v55, %s3576_s24  ;;  %v4465_v55 = vld [vmem:[%s3627_s22 + $0xa0] sm:$0x3] }
  0x8c   : > { %3311 = vrot.lane.b32.xlu0 %v5438_v58, %s3576_s24  ;;  %v3042_v47 = vpop.permute.xlu1 %3041  ;;  %v5449_v58 = vpack.i.bf16 %v5448_v9, %v5399_v40 }
  0x8d   : > { %v3044_v31 = vunpack.i.h.bf16 %v3042_v47  ;;  %v3043_v3 = vunpack.i.l.bf16 %v3042_v47  ;;  %v5450_v47 = vld [vmem:[#allocation5_spill] sm:$0xff] }
  0x8e   : > { %v3032_v42 = vpop.permute.xlu0 %3031  ;;  %3326 = vrot.lane.b32.xlu1 %v5440_v48, %s3575_s23 }
  0x8f   : > { %v3034_v15 = vunpack.i.h.bf16 %v3032_v42  ;;  %v3033_v20 = vunpack.i.l.bf16 %v3032_v42 }
  0x90   : > { %3321 = vrot.lane.b32.xlu0 %v5442_v49, %s3576_s24  ;;  %v3047_v36 = vpop.permute.xlu1 %3046 }
  0x91   : > { %v744_v6 = vsel %vm727_vm3, %v5443_v11, %v3033_v20  ;;  %v745_v33 = vsel %vm727_vm3, %v5444_v8, %v3034_v15  ;;  %v3049_v2 = vunpack.i.h.bf16 %v3047_v36  ;;  %v3048_v38 = vunpack.i.l.bf16 %v3047_v36  ;;  %v2682_v11 = vld [vmem:[%s3627_s22 + $0xb0] sm:$0xff] }
  0x92   : > { %v3037_v26 = vpop.permute.xlu0 %3036  ;;  %v777_v30 = vsel %vm760_vm4, %v744_v6, %v3043_v3  ;;  %v778_v7 = vsel %vm760_vm4, %v745_v33, %v3044_v31  ;;  %3336 = vrot.lane.b32.xlu1 %v5447_v50, %s3575_s23  ;;  %v5451_v3 = vld [vmem:[#allocation4_spill] sm:$0xff]  ;;  %v916_v15 = vrot.slane %v4455_v14, 1  ;;  %v917_v20 = vrot.slane %v4458_v24, 1  ;;  %v2683_v6 = vld [vmem:[%s3627_s22 + $0xb8] sm:$0x3] }
  0x93   : > { %v3039_v23 = vunpack.i.h.bf16 %v3037_v26  ;;  %v3038_v45 = vunpack.i.l.bf16 %v3037_v26  ;;  %v2902_v43 = vpack.c.bf16 %v778_v7, %v777_v30  ;;  %v919_v36 = vrot.slane %v4465_v55, 1  ;;  %v5452_v26 = vld [vmem:[#allocation15_spill] sm:$0xff]  ;;  %v5454_v50 = vld [vmem:[#allocation24_spill] sm:$0xff] }
  0x94   : > { %3331 = vrot.lane.b32.xlu0 %v5449_v58, %s3576_s24  ;;  %v3057_v35 = vpop.permute.xlu1 %3056  ;;  %v5453_v30 = vpack.i.bf16 %v5452_v26, %v5403_v16  ;;  %v4499_v9 = vsel %vm373_vm1, %v916_v15, %v917_v20  ;;  %v4501_v58 = vrot.slane %v2682_v11, 1  ;;  %v5457_v26 = vld [vmem:[#allocation6_spill] sm:$0xff] }
  0x95   : > { %v729_v31 = vsel %vm727_vm3, %v5450_v47, %v3039_v23  ;;  %v728_v42 = vsel %vm727_vm3, %v5451_v3, %v3038_v45  ;;  %2904 = vmatprep.subr.msk.bf16.mxu0 %vm4450_vm5, %v2902_v43  ;;  %v3059_v8 = vunpack.i.h.bf16 %v3057_v35  ;;  %v3058_v33 = vunpack.i.l.bf16 %v3057_v35 }
  0x96   : > { %v3052_v48 = vpop.permute.xlu0 %3051  ;;  %v761_v44 = vsel %vm760_vm4, %v728_v42, %v3048_v38  ;;  %v762_v49 = vsel %vm760_vm4, %v729_v31, %v3049_v2  ;;  %3346 = vrot.lane.b32.xlu1 %v5453_v30, %s3575_s23  ;;  %v5455_v38 = vpack.i.bf16 %v5454_v50, %v5385_v37  ;;  %v1772_v2 = vrot.slane %v4480_v61, 1  ;;  %v5459_v50 = vld [vmem:[#allocation9_spill] sm:$0xff] }
  0x97   : > { %v2905_v7 = vpack.c.bf16 %v762_v49, %v761_v44  ;;  %v3054_v23 = vunpack.i.h.bf16 %v3052_v48  ;;  %v3053_v45 = vunpack.i.l.bf16 %v3052_v48  ;;  %v1775_v47 = vrot.slane %v2683_v6, 1  ;;  %v5456_v44 = vld [vmem:[#allocation7_spill] sm:$0xff] }
  0x98   : > { %3341 = vrot.lane.b32.xlu0 %v5455_v38, %s3575_s23  ;;  %v3067_v43 = vpop.permute.xlu1 %3066  ;;  %v1948_v31 = vrot.slane %v4480_v61, 2  ;;  %v4505_v37 = vsel %vm373_vm1, %v917_v20, %v919_v36  ;;  %v4507_v48 = vrot.slane %v2682_v11, 2  ;;  %v731_v49 = vsel %vm727_vm3, %v5456_v44, %v3059_v8  ;;  %v5460_v36 = vld [vmem:[#allocation8_spill] sm:$0xff] }
  0x99   : > { %2907 = vmatpush3.bf16.xpose.msk.msra.mxu0 %vm4450_vm5, %v2905_v7  ;;  %v3069_v3 = vunpack.i.h.bf16 %v3067_v43  ;;  %v3068_v42 = vunpack.i.l.bf16 %v3067_v43  ;;  %v730_v15 = vsel %vm727_vm3, %v5457_v26, %v3058_v33  ;;  %v5458_v61 = vpack.i.bf16 %v4261_v46, %v3962_v5  ;;  %v4530_v26 = vld [vmem:[%s3627_s22 + $0x180] sm:$0xff] }
  0x9a   : > { %v3062_v35 = vpop.permute.xlu0 %3061  ;;  %v747_v20 = vsel %vm727_vm3, %v5459_v50, %v3054_v23  ;;  %v746_v11 = vsel %vm727_vm3, %v5460_v36, %v3053_v45  ;;  %v5461_v33 = vpack.i.bf16 %v4265_v27, %v5389_v10  ;;  %v1951_v44 = vrot.slane %v2683_v6, 2  ;;  %v4533_v45 = vld [vmem:[%s3627_s22 + $0x188] sm:$0xff]  ;;  %v4539_v27 = vld [vmem:[%s3627_s22 + $0x190] sm:$0x3] }
  0x9b   : > { %v3064_v30 = vunpack.i.h.bf16 %v3062_v35  ;;  %v3063_v7 = vunpack.i.l.bf16 %v3062_v35  ;;  %3356 = vrot.lane.b32.xlu1 %v5458_v61, %s3576_s24  ;;  %v763_v8 = vsel %vm760_vm4, %v730_v15, %v3068_v42  ;;  %v764_v38 = vsel %vm760_vm4, %v731_v49, %v3069_v3  ;;  %v4542_v61 = vld [vmem:[%s3627_s22 + $0x168] sm:$0xff] }
  0x9c   : > { %3351 = vrot.lane.b32.xlu0 %v5461_v33, %s3576_s24  ;;  %v2911_v43 = vpack.c.bf16 %v764_v38, %v763_v8  ;;  %v3077_v23 = vpop.permute.xlu1 %3076  ;;  %v1092_v3 = vrot.slane %v4455_v14, 2  ;;  %v1093_v49 = vrot.slane %v4458_v24, 2  ;;  %v1095_v10 = vrot.slane %v4465_v55, 2  ;;  %v5462_v8 = vld [vmem:[#allocation10_spill] sm:$0xff]  ;;  %v4590_v33 = vld [vmem:[%s3627_s22 + $0x30] sm:$0xff] }
  0x9d   : > { %v779_v46 = vsel %vm760_vm4, %v746_v11, %v3063_v7  ;;  %v780_v35 = vsel %vm760_vm4, %v747_v20, %v3064_v30  ;;  %v3079_v7 = vunpack.i.h.bf16 %v3077_v23  ;;  %v3078_v30 = vunpack.i.l.bf16 %v3077_v23  ;;  %v4599_v23 = vld [vmem:[%s3627_s22 + $0x178] sm:$0x3] }
  0x9e   : > { %v2908_v42 = vpack.c.bf16 %v780_v35, %v779_v46  ;;  %v3072_v15 = vpop.permute.xlu0 %3071  ;;  %v4550_v6 = vsel %vm373_vm1, %v1772_v2, %v4501_v58  ;;  %v4554_v14 = vsel %vm373_vm1, %v4501_v58, %v1775_v47  ;;  %v1817_v32 = vrot.slane %v4530_v26, 1 }
  0x9f   : > { %3366 = vrot.lane.b32.xlu1 %v3365_v18, %s3575_s23  ;;  %v3074_v24 = vunpack.i.h.bf16 %v3072_v15  ;;  %v3073_v55 = vunpack.i.l.bf16 %v3072_v15  ;;  %v4564_v18 = vrot.slane %v4533_v45, 1  ;;  %v4570_v2 = vsel %vm550_vm0, %v1948_v31, %v4507_v48  ;;  %v4585_v31 = vld [vmem:[%s3627_s22 + $0x170] sm:$0xff]  ;;  %v5464_v15 = vld [vmem:[#allocation11_spill] sm:$0xff] }
  0xa0   : > { %3361 = vrot.lane.b32.xlu0 %v3360_v41, %s3576_s24  ;;  %2910 = vmatprep.subr.msk.bf16.mxu0 %vm4450_vm5, %v2908_v42  ;;  %v3087_v34 = vpop.permute.xlu1 %3086  ;;  %v4574_v40 = vsel %vm550_vm0, %v4507_v48, %v1951_v44  ;;  %v1820_v12 = vrot.slane %v4539_v27, 1  ;;  %v961_v41 = vrot.slane %v4542_v61, 1  ;;  %v4579_v36 = vsel %vm550_vm0, %v1092_v3, %v1093_v49  ;;  %v5463_v44 = vld [vmem:[#allocation12_spill] sm:$0xff] }
  0xa1   : > { %2913 = vmatpush3.bf16.xpose.msk.msra.mxu0 %vm4450_vm5, %v2911_v43  ;;  %v3089_v47 = vunpack.i.h.bf16 %v3087_v34  ;;  %v3088_v50 = vunpack.i.l.bf16 %v3087_v34  ;;  %v4582_v11 = vsel %vm550_vm0, %v1093_v49, %v1095_v10  ;;  %v733_v38 = vsel %vm727_vm3, %v5462_v8, %v3079_v7 }
  0xa2   : > { %v3082_v20 = vpop.permute.xlu0 %3081  ;;  %v732_v43 = vsel %vm727_vm3, %v4590_v33, %v3078_v30  ;;  %v749_v42 = vsel %vm727_vm3, %v5463_v44, %v3074_v24  ;;  %v748_v3 = vsel %vm727_vm3, %v5464_v15, %v3073_v55  ;;  %v962_v24 = vrot.slane %v4585_v31, 1  ;;  %v4662_v15 = vld [vmem:[%s3627_s22 + $0x48] sm:$0xff] }
  0xa3   : > { %v3084_v46 = vunpack.i.h.bf16 %v3082_v20  ;;  %v3083_v35 = vunpack.i.l.bf16 %v3082_v20  ;;  %3376 = vrot.lane.b32.xlu1 %v3375_v39, %s3575_s23  ;;  %v765_v49 = vsel %vm760_vm4, %v732_v43, %v3088_v50  ;;  %v766_v10 = vsel %vm760_vm4, %v733_v38, %v3089_v47 }
  0xa4   : > { %3371 = vrot.lane.b32.xlu0 %v3370_v19, %s3576_s24  ;;  %v2917_v56 = vpack.c.bf16 %v766_v10, %v765_v49  ;;  %v3097_v30 = vpop.permute.xlu1 %3096  ;;  %v3400_v50 = vpack.i.bf16 %v4505_v37, %v4499_v9  ;;  %v3410_v47 = vpack.i.bf16 %v4554_v14, %v4550_v6  ;;  %v964_v0 = vrot.slane %v4599_v23, 1  ;;  %v4630_v9 = vld [vmem:[%s3627_s22 + $0xb8] sm:$0x3]  ;;  %v4676_v10 = vld [vmem:[%s3627_s22 + $0x108] sm:$0xff] }
  0xa5   : > { %v781_v39 = vsel %vm760_vm4, %v748_v3, %v3083_v35  ;;  %v782_v7 = vsel %vm760_vm4, %v749_v42, %v3084_v46  ;;  %v3099_v57 = vunpack.i.h.bf16 %v3097_v30  ;;  %v3098_v19 = vunpack.i.l.bf16 %v3097_v30  ;;  %v4657_v42 = vld [vmem:[%s3627_s22 + $0x50] sm:$0xff] }
  0xa6   : > { %v2914_v34 = vpack.c.bf16 %v782_v7, %v781_v39  ;;  %v3092_v55 = vpop.permute.xlu0 %3091  ;;  %v3425_v20 = vpack.i.bf16 %v4574_v40, %v4570_v2  ;;  %v4627_v8 = vsel %vm373_vm1, %v1817_v32, %v4564_v18  ;;  %v3420_v29 = vpack.i.bf16 %v4582_v11, %v4579_v36  ;;  %v4671_v3 = vld [vmem:[%s3627_s22 + $0x110] sm:$0xff] }
  0xa7   : > { %3386 = vrot.lane.b32.xlu1 %v3385_v60, %s3575_s23  ;;  %v3094_v37 = vunpack.i.h.bf16 %v3092_v55  ;;  %v3093_v38 = vunpack.i.l.bf16 %v3092_v55  ;;  %v4642_v22 = vsel %vm373_vm1, %v4564_v18, %v1820_v12  ;;  %v4647_v32 = vsel %vm373_vm1, %v961_v41, %v962_v24 }
  0xa8   : > { %3381 = vrot.lane.b32.xlu0 %v3380_v25, %s3575_s23  ;;  %2916 = vmatprep.subr.msk.bf16.mxu0 %vm4450_vm5, %v2914_v34  ;;  %v3107_v60 = vpop.permute.xlu1 %3106  ;;  %v1137_v16 = vrot.slane %v4542_v61, 2  ;;  %v1138_v59 = vrot.slane %v4585_v31, 2  ;;  %v1140_v25 = vrot.slane %v4599_v23, 2  ;;  %v4653_v12 = vsel %vm373_vm1, %v962_v24, %v964_v0 }
  0xa9   : > { %2919 = vmatpush3.bf16.xpose.msk.msra.mxu0 %vm4450_vm5, %v2917_v56  ;;  %v3109_v43 = vunpack.i.h.bf16 %v3107_v60  ;;  %v3108_v46 = vunpack.i.l.bf16 %v3107_v60  ;;  %v924_v44 = vrot.slane %v4630_v9, 1  ;;  %v735_v41 = vsel %vm727_vm3, %v4657_v42, %v3099_v57 }
  0xaa   : > { %v3102_v35 = vpop.permute.xlu0 %3101  ;;  %v734_v61 = vsel %vm727_vm3, %v4662_v15, %v3098_v19  ;;  %v751_v49 = vsel %vm727_vm3, %v4671_v3, %v3094_v37  ;;  %v750_v56 = vsel %vm727_vm3, %v4676_v10, %v3093_v38  ;;  %v3435_v24 = vpack.i.bf16 %v4642_v22, %v4627_v8  ;;  %v4701_v19 = vld [vmem:[%s3627_s22 + $0xd0] sm:$0x3] }
  0xab   : > { %v3104_v31 = vunpack.i.h.bf16 %v3102_v35  ;;  %v3103_v23 = vunpack.i.l.bf16 %v3102_v35  ;;  %3396 = vrot.lane.b32.xlu1 %v3395_v53, %s3576_s24  ;;  %v767_v39 = vsel %vm760_vm4, %v734_v61, %v3108_v46  ;;  %v768_v7 = vsel %vm760_vm4, %v735_v41, %v3109_v43  ;;  %v4732_v41 = vld [vmem:[%s3627_s22 + $0x68] sm:$0xff] }
  0xac   : > { %3391 = vrot.lane.b32.xlu0 %v3390_v54, %s3576_s24  ;;  %v2923_v62 = vpack.c.bf16 %v768_v7, %v767_v39  ;;  %v3117_v30 = vpop.permute.xlu1 %3116  ;;  %v3430_v0 = vpack.i.bf16 %v4653_v12, %v4647_v32  ;;  %v4693_v57 = vsel %vm550_vm0, %v1137_v16, %v1138_v59  ;;  %v1993_v5 = vrot.slane %v4530_v26, 2  ;;  %v2685_v54 = vld [vmem:[%s3627_s22 + $0xc8] sm:$0xff] }
  0xad   : > { %v783_v28 = vsel %vm760_vm4, %v750_v56, %v3103_v23  ;;  %v784_v53 = vsel %vm760_vm4, %v751_v49, %v3104_v31  ;;  %v3119_v37 = vunpack.i.h.bf16 %v3117_v30  ;;  %v3118_v38 = vunpack.i.l.bf16 %v3117_v30  ;;  %v4737_v31 = vld [vmem:[%s3627_s22 + $0x60] sm:$0xff]  ;;  %v4746_v39 = vld [vmem:[%s3627_s22 + $0x128] sm:$0xff] }
  0xae   : > { %v2920_v34 = vpack.c.bf16 %v784_v53, %v783_v28  ;;  %v3112_v55 = vpop.permute.xlu0 %3111  ;;  %v4708_v60 = vsel %vm550_vm0, %v1138_v59, %v1140_v25  ;;  %v4711_v16 = vrot.slane %v4533_v45, 2  ;;  %v4718_v46 = vsel %vm373_vm1, %v4501_v58, %v924_v44 }
  0xaf   : > { %3406 = vrot.lane.b32.xlu1 %v3405_v52, %s3575_s23  ;;  %v3114_v43 = vunpack.i.h.bf16 %v3112_v55  ;;  %v3113_v26 = vunpack.i.l.bf16 %v3112_v55  ;;  %v1996_v51 = vrot.slane %v4539_v27, 2  ;;  %v1777_v52 = vrot.slane %v4697_v63, 1 }
  0xb0   : > { %3401 = vrot.lane.b32.xlu0 %v3400_v50, %s3576_s24  ;;  %2922 = vmatprep.subr.msk.bf16.mxu0 %vm4450_vm5, %v2920_v34  ;;  %v3127_v13 = vpop.permute.xlu1 %3126  ;;  %v4724_v45 = vrot.slane %v2685_v54, 1  ;;  %v1780_v50 = vrot.slane %v4701_v19, 1  ;;  %v1953_v59 = vrot.slane %v4697_v63, 2  ;;  %v4728_v44 = vrot.slane %v2685_v54, 2 }
  0xb1   : > { %2925 = vmatpush3.bf16.xpose.msk.msra.mxu0 %vm4450_vm5, %v2923_v62  ;;  %v3129_v25 = vunpack.i.h.bf16 %v3127_v13  ;;  %v3128_v35 = vunpack.i.l.bf16 %v3127_v13  ;;  %v1956_v27 = vrot.slane %v4701_v19, 2  ;;  %v737_v61 = vsel %vm727_vm3, %v4732_v41, %v3119_v37  ;;  %v4751_v62 = vld [vmem:[%s3627_s22 + $0x120] sm:$0xff] }
  0xb2   : > { %v3122_v58 = vpop.permute.xlu0 %3121  ;;  %v736_v23 = vsel %vm727_vm3, %v4737_v31, %v3118_v38  ;;  %v753_v7 = vsel %vm727_vm3, %v4746_v39, %v3114_v43  ;;  %v752_v28 = vsel %vm727_vm3, %v4751_v62, %v3113_v26  ;;  %v1100_v55 = vrot.slane %v4630_v9, 2  ;;  %v4776_v38 = vld [vmem:[%s3627_s22 + $0x1a0] sm:$0xff] }
  0xb3   : > { %v3124_v49 = vunpack.i.h.bf16 %v3122_v58  ;;  %v3123_v56 = vunpack.i.l.bf16 %v3122_v58  ;;  %3416 = vrot.lane.b32.xlu1 %v3415_v17, %s3575_s23  ;;  %v769_v53 = vsel %vm760_vm4, %v736_v23, %v3128_v35  ;;  %v770_v30 = vsel %vm760_vm4, %v737_v61, %v3129_v25  ;;  %v4825_v58 = vld [vmem:[%s3627_s22 + $0x80] sm:$0xff] }
  0xb4   : > { %3411 = vrot.lane.b32.xlu0 %v3410_v47, %s3576_s24  ;;  %v2929_v21 = vpack.c.bf16 %v770_v30, %v769_v53  ;;  %v3137_v34 = vpop.permute.xlu1 %3136  ;;  %v3445_v19 = vpack.i.bf16 %v4708_v60, %v4693_v57  ;;  %v3440_v37 = vpack.i.bf16 %v4718_v46, %v4550_v6  ;;  %v4770_v14 = vsel %vm550_vm0, %v1993_v5, %v4711_v16  ;;  %v4773_v47 = vld [vmem:[%s3627_s22 + $0x198] sm:$0xff]  ;;  %v4791_v57 = vld [vmem:[%s3627_s22 + $0x1a8] sm:$0x3]  ;;  %v4794_v5 = vld [vmem:[%s3627_s22 + $0x190] sm:$0x3] }
  0xb5   : > { %v785_v1 = vsel %vm760_vm4, %v752_v28, %v3123_v56  ;;  %v786_v17 = vsel %vm760_vm4, %v753_v7, %v3124_v49  ;;  %v3139_v43 = vunpack.i.h.bf16 %v3137_v34  ;;  %v3138_v26 = vunpack.i.l.bf16 %v3137_v34  ;;  %v4839_v56 = vld [vmem:[%s3627_s22 + $0xd0] sm:$0x3]  ;;  %v4842_v7 = vld [vmem:[%s3627_s22 + $0x140] sm:$0xff]  ;;  %v4847_v53 = vld [vmem:[%s3627_s22 + $0x138] sm:$0xff] }
  0xb6   : > { %v2926_v63 = vpack.c.bf16 %v786_v17, %v785_v1  ;;  %v3132_v54 = vpop.permute.xlu0 %3131  ;;  %v4784_v9 = vsel %vm550_vm0, %v4711_v16, %v1996_v51  ;;  %v4788_v6 = vsel %vm373_vm1, %v1777_v52, %v4724_v45  ;;  %v4804_v40 = vsel %vm373_vm1, %v4724_v45, %v1780_v50 }
  0xb7   : > { %3426 = vrot.lane.b32.xlu1 %v3425_v20, %s3575_s23  ;;  %v3134_v60 = vunpack.i.h.bf16 %v3132_v54  ;;  %v3133_v46 = vunpack.i.l.bf16 %v3132_v54  ;;  %v4808_v20 = vsel %vm550_vm0, %v1953_v59, %v4728_v44  ;;  %v4814_v36 = vsel %vm550_vm0, %v4728_v44, %v1956_v27 }
  0xb8   : > { %3421 = vrot.lane.b32.xlu0 %v3420_v29, %s3575_s23  ;;  %2928 = vmatprep.subr.msk.bf16.mxu0 %vm4450_vm5, %v2926_v63  ;;  %v3147_v51 = vpop.permute.xlu1 %3146  ;;  %v4818_v11 = vsel %vm550_vm0, %v4507_v48, %v1100_v55  ;;  %v1822_v29 = vrot.slane %v4773_v47, 1  ;;  %v1823_v13 = vrot.slane %v4776_v38, 1  ;;  %v1825_v25 = vrot.slane %v4791_v57, 1  ;;  %v4830_v48 = vld [vmem:[%s3627_s22 + $0x78] sm:$0xff] }
  0xb9   : > { %2931 = vmatpush3.bf16.xpose.msk.msra.mxu0 %vm4450_vm5, %v2929_v21  ;;  %v3149_v52 = vunpack.i.h.bf16 %v3147_v51  ;;  %v3148_v50 = vunpack.i.l.bf16 %v3147_v51  ;;  %v969_v35 = vrot.slane %v4794_v5, 1  ;;  %v739_v27 = vsel %vm727_vm3, %v4825_v58, %v3139_v43 }
  0xba   : > { %v3142_v59 = vpop.permute.xlu0 %3141  ;;  %v738_v61 = vsel %vm727_vm3, %v4830_v48, %v3138_v26  ;;  %v755_v28 = vsel %vm727_vm3, %v4842_v7, %v3134_v60  ;;  %v754_v30 = vsel %vm727_vm3, %v4847_v53, %v3133_v46  ;;  %v1145_v55 = vrot.slane %v4794_v5, 2 }
  0xbb   : > { %v3144_v23 = vunpack.i.h.bf16 %v3142_v59  ;;  %v3143_v49 = vunpack.i.l.bf16 %v3142_v59  ;;  %3436 = vrot.lane.b32.xlu1 %v3435_v24, %s3576_s24  ;;  %v771_v21 = vsel %vm760_vm4, %v738_v61, %v3148_v50  ;;  %v772_v1 = vsel %vm760_vm4, %v739_v27, %v3149_v52 }
  0xbc   : > { %3431 = vrot.lane.b32.xlu0 %v3430_v0, %s3576_s24  ;;  %v2935_v22 = vpack.c.bf16 %v772_v1, %v771_v21  ;;  %v3157_v34 = vpop.permute.xlu1 %3156  ;;  %v4861_v43 = vsel %vm373_vm1, %v1822_v29, %v1823_v13  ;;  %v4864_v26 = vsel %vm373_vm1, %v1823_v13, %v1825_v25  ;;  %v929_v60 = vrot.slane %v4839_v56, 1 }
  0xbd   : > { %v787_v24 = vsel %vm760_vm4, %v754_v30, %v3143_v49  ;;  %v788_v17 = vsel %vm760_vm4, %v755_v28, %v3144_v23  ;;  %v3159_v32 = vunpack.i.h.bf16 %v3157_v34  ;;  %v3158_v12 = vunpack.i.l.bf16 %v3157_v34  ;;  %v4912_v49 = vld [vmem:[%s3627_s22 + $0xe0] sm:$0xff]  ;;  %v4920_v30 = vld [vmem:[%s3627_s22 + $0x150] sm:$0xff] }
  0xbe   : > { %v2932_v63 = vpack.c.bf16 %v788_v17, %v787_v24  ;;  %v3152_v54 = vpop.permute.xlu0 %3151  ;;  %v3455_v0 = vpack.i.bf16 %v4784_v9, %v4770_v14  ;;  %v3450_v5 = vpack.i.bf16 %v4804_v40, %v4788_v6  ;;  %v3465_v29 = vpack.i.bf16 %v4814_v36, %v4808_v20 }
  0xbf   : > { %3446 = vrot.lane.b32.xlu1 %v3445_v19, %s3575_s23  ;;  %v3154_v46 = vunpack.i.h.bf16 %v3152_v54  ;;  %v3153_v51 = vunpack.i.l.bf16 %v3152_v54  ;;  %v3460_v19 = vpack.i.bf16 %v4818_v11, %v4570_v2  ;;  %v3475_v40 = vpack.i.bf16 %v4864_v26, %v4861_v43  ;;  %v2689_v54 = vld [vmem:[%s3627_s22 + $0xe8] sm:$0x3] }
  0xc0   : > { %3441 = vrot.lane.b32.xlu0 %v3440_v37, %s3576_s24  ;;  %2934 = vmatprep.subr.msk.bf16.mxu0 %vm4450_vm5, %v2932_v63  ;;  %v3167_v9 = vpop.permute.xlu1 %3166  ;;  %v4885_v37 = vsel %vm373_vm1, %v4564_v18, %v969_v35  ;;  %v1998_v13 = vrot.slane %v4773_v47, 2  ;;  %v1999_v36 = vrot.slane %v4776_v38, 2  ;;  %v4891_v50 = vsel %vm550_vm0, %v4711_v16, %v1145_v55  ;;  %v4898_v18 = vld [vmem:[%s3627_s22 + $0x98] sm:$0xff]  ;;  %v4903_v35 = vld [vmem:[%s3627_s22 + $0x90] sm:$0xff] }
  0xc1   : > { %2937 = vmatpush3.bf16.xpose.msk.msra.mxu0 %vm4450_vm5, %v2935_v22  ;;  %v3169_v52 = vunpack.i.h.bf16 %v3167_v9  ;;  %v3168_v2 = vunpack.i.l.bf16 %v3167_v9  ;;  %v4895_v59 = vsel %vm373_vm1, %v4724_v45, %v929_v60  ;;  %v741_v25 = vsel %vm727_vm3, %v4898_v18, %v3159_v32  ;;  %v4909_v16 = vld [vmem:[%s3627_s22 + $0xd8] sm:$0xff] }
  0xc2   : > { %v3162_v11 = vpop.permute.xlu0 %3161  ;;  %v740_v27 = vsel %vm727_vm3, %v4903_v35, %v3158_v12  ;;  %v4915_v45 = vld [vmem:[%s3627_s22 + $0x158] sm:$0xff]  ;;  %v756_v21 = vsel %vm727_vm3, %v4920_v30, %v3153_v51  ;;  %v3470_v63 = vpack.i.bf16 %v4885_v37, %v4627_v8  ;;  %v2001_v12 = vrot.slane %v4791_v57, 2 }
  0xc3   : > { %v3164_v61 = vunpack.i.h.bf16 %v3162_v11  ;;  %v3163_v23 = vunpack.i.l.bf16 %v3162_v11  ;;  %3456 = vrot.lane.b32.xlu1 %v3455_v0, %s3575_s23  ;;  %v757_v28 = vsel %vm727_vm3, %v4915_v45, %v3154_v46  ;;  %v773_v1 = vsel %vm760_vm4, %v740_v27, %v3168_v2 }
  0xc4   : > { %v774_v22 = vsel %vm760_vm4, %v741_v25, %v3169_v52  ;;  %3451 = vrot.lane.b32.xlu0 %v3450_v5, %s3576_s24  ;;  %v3177_v55 = vpop.permute.xlu1 %3176  ;;  %v1782_v0 = vrot.slane %v4909_v16, 1  ;;  %v1783_v46 = vrot.slane %v4912_v49, 1  ;;  %v3485_v9 = vpack.i.bf16 %v4891_v50, %v4770_v14 }
  0xc5   : > { %v2941_v24 = vpack.c.bf16 %v774_v22, %v773_v1  ;;  %v789_v17 = vsel %vm760_vm4, %v756_v21, %v3163_v23  ;;  %v790_v34 = vsel %vm760_vm4, %v757_v28, %v3164_v61  ;;  %v3179_v51 = vunpack.i.h.bf16 %v3177_v55  ;;  %v3530_v61 = vld [vmem:[%s3627_s22 + $0xb0] sm:$0xff]  ;;  %v3531_v28 = vld [vmem:[%s3627_s22 + $0xa8] sm:$0xff] }
  0xc6   : > { %v2938_v60 = vpack.c.bf16 %v790_v34, %v789_v17  ;;  %v3172_v32 = vpop.permute.xlu0 %3171  ;;  %v3178_v5 = vunpack.i.l.bf16 %v3177_v55  ;;  %v3480_v52 = vpack.i.bf16 %v4895_v59, %v4788_v6  ;;  %v2000_v57 = vsel %vm550_vm0, %v1998_v13, %v1999_v36 }
  0xc7   : > { %3466 = vrot.lane.b32.xlu1 %v3465_v29, %s3575_s23  ;;  %v3174_v8 = vunpack.i.h.bf16 %v3172_v32  ;;  %v3173_v37 = vunpack.i.l.bf16 %v3172_v32  ;;  %v1785_v2 = vrot.slane %v2689_v54, 1  ;;  %v1958_v14 = vrot.slane %v4909_v16, 2 }
  0xc8   : > { %3461 = vrot.lane.b32.xlu0 %v3460_v19, %s3575_s23  ;;  %2940 = vmatprep.subr.msk.bf16.mxu0 %vm4450_vm5, %v2938_v60  ;;  %v3187_v29 = vpop.permute.xlu1 %3186  ;;  %v1959_v6 = vrot.slane %v4912_v49, 2  ;;  %v1961_v11 = vrot.slane %v2689_v54, 2  ;;  %v1105_v19 = vrot.slane %v4839_v56, 2  ;;  %v2002_v27 = vsel %vm550_vm0, %v1999_v36, %v2001_v12  ;;  %v4960_v56 = vld [vmem:[%s3627_s22 + $0x170] sm:$0xff] }
  0xc9   : > { %2943 = vmatpush3.bf16.xpose.msk.msra.mxu0 %vm4450_vm5, %v2941_v24  ;;  %v3189_v50 = vunpack.i.h.bf16 %v3187_v29  ;;  %v3188_v59 = vunpack.i.l.bf16 %v3187_v29  ;;  %v1784_v13 = vsel %vm373_vm1, %v1782_v0, %v1783_v46  ;;  %v743_v23 = vsel %vm727_vm3, %v3530_v61, %v3179_v51  ;;  %v4965_v24 = vld [vmem:[%s3627_s22 + $0x168] sm:$0xff] }
  0xca   : > { %v3182_v25 = vpop.permute.xlu0 %3181  ;;  %v742_v21 = vsel %vm727_vm3, %v3531_v28, %v3178_v5  ;;  %v759_v36 = vsel %vm727_vm3, %v4960_v56, %v3174_v8  ;;  %v758_v17 = vsel %vm727_vm3, %v4965_v24, %v3173_v37  ;;  %v1786_v60 = vsel %vm373_vm1, %v1783_v46, %v1785_v2  ;;  %v4984_v46 = vld [vmem:[%s5289_s1 + $0x8] sm:$0xff]  ;;  %v3536_v28 = vld [vmem:[%s3627_s22 + $0xf8] sm:$0xff] }
  0xcb   : > { %v3184_v1 = vunpack.i.h.bf16 %v3182_v25  ;;  %v3183_v22 = vunpack.i.l.bf16 %v3182_v25  ;;  %3476 = vrot.lane.b32.xlu1 %v3475_v40, %s3576_s24  ;;  %v775_v34 = vsel %vm760_vm4, %v742_v21, %v3188_v59  ;;  %v776_v55 = vsel %vm760_vm4, %v743_v23, %v3189_v50  ;;  %2784 = vmatprep.mubr.msk.f32.mxu1 %vm1309_vm2, %v4984_v46  ;;  %v3534_v50 = vld [vmem:[%s3627_s22 + $0xd8] sm:$0xff]  ;;  %v3535_v25 = vld [vmem:[%s3627_s22 + $0xe0] sm:$0xff] }
  0xcc   : > { %3471 = vrot.lane.b32.xlu0 %v3470_v63, %s3576_s24  ;;  %v2947_v54 = vpack.c.bf16 %v776_v55, %v775_v34  ;;  %v3197_v40 = vpop.permute.xlu1 %3196  ;;  %v3495_v5 = vpack.i.bf16 %v2002_v27, %v2000_v57  ;;  %v3490_v63 = vpack.i.bf16 %v1786_v60, %v1784_v13  ;;  %v1960_v8 = vsel %vm550_vm0, %v1958_v14, %v1959_v6  ;;  %v3537_v34 = vld [vmem:[%s3627_s22 + $0xf0] sm:$0xff] }
  0xcd   : > { %v791_v43 = vsel %vm760_vm4, %v758_v17, %v3183_v22  ;;  %v792_v26 = vsel %vm760_vm4, %v759_v36, %v3184_v1  ;;  %v1962_v37 = vsel %vm550_vm0, %v1959_v6, %v1961_v11  ;;  %v3199_v57 = vunpack.i.h.bf16 %v3197_v40  ;;  %v5006_v17 = vld [vmem:[%s5289_s1 + $0x10] sm:$0xff] }
  0xce   : > { %v2944_v32 = vpack.c.bf16 %v792_v26, %v791_v43  ;;  %v3192_v12 = vpop.permute.xlu0 %3191  ;;  %v3198_v6 = vunpack.i.l.bf16 %v3197_v40  ;;  %v3505_v11 = vpack.i.bf16 %v1962_v37, %v1960_v8 }
  0xcf   : > { %v3194_v0 = vunpack.i.h.bf16 %v3192_v12  ;;  %v3193_v51 = vunpack.i.l.bf16 %v3192_v12  ;;  %3486 = vrot.lane.b32.xlu1 %v3485_v9, %s3575_s23  ;;  %v2116_v21 = vsel %vm727_vm3, %v3536_v28, %v3199_v57 }
  0xd0   : > { %3481 = vrot.lane.b32.xlu0 %v3480_v52, %s3576_s24  ;;  %2946 = vmatprep.subr.msk.bf16.mxu0 %vm4450_vm5, %v2944_v32  ;;  %v3207_v9 = vpop.permute.xlu1 %3206  ;;  %v1106_v52 = vsel %vm550_vm0, %v4728_v44, %v1105_v19  ;;  %v5465_v32 = vld [vmem:[#allocation17_spill] sm:$0xff] }
  0xd1   : > { %2949 = vmatpush3.bf16.xpose.msk.msra.mxu0 %vm4450_vm5, %v2947_v54  ;;  %v3209_v2 = vunpack.i.h.bf16 %v3207_v9  ;;  %v3208_v29 = vunpack.i.l.bf16 %v3207_v9  ;;  %v1259_v59 = vsel %vm727_vm3, %v3534_v50, %v3193_v51  ;;  %v1260_v27 = vsel %vm727_vm3, %v3535_v25, %v3194_v0  ;;  %v3538_v9 = vld [vmem:[%s3627_s22 + $0x38] sm:$0xff] }
  0xd2   : > { %v3202_v14 = vpop.permute.xlu0 %3201  ;;  %v3500_v44 = vpack.i.bf16 %v1106_v52, %v4808_v20  ;;  %v2115_v20 = vsel %vm727_vm3, %v3537_v34, %v3198_v6  ;;  %v3577_v51 = vmov 0  }
  0xd3   : > { %3496 = vrot.lane.b32.xlu1 %v3495_v5, %s3575_s23  ;;  %v1291_v19 = vsel %vm760_vm4, %v1259_v59, %v3208_v29  ;;  %v1292_v13 = vsel %vm760_vm4, %v1260_v27, %v3209_v2  ;;  %v3204_v43 = vunpack.i.h.bf16 %v3202_v14  ;;  %v3203_v26 = vunpack.i.l.bf16 %v3202_v14  ;;  %3510 = vset.pattern.permute.xlu0 %v3577_v51  ;;  %v2337_v5 = vld [vmem:[%s5290_s2] sm:$0xff] }
  0xd4   : > { %3491 = vrot.lane.b32.xlu0 %v3490_v63, %s3576_s24  ;;  %v3217_v61 = vpop.permute.xlu1 %3216  ;;  %v2854_v23 = vpack.c.bf16 %v1292_v13, %v1291_v19  ;;  %v3539_v14 = vld [vmem:[%s3627_s22 + $0x20] sm:$0xff] }
  0xd5   : > { %v3219_v1 = vunpack.i.h.bf16 %v3217_v61  ;;  %v3218_v22 = vunpack.i.l.bf16 %v3217_v61  ;;  %v1244_v6 = vsel %vm727_vm3, %v3539_v14, %v3204_v43 }
  0xd6   : > { %v3212_v36 = vpop.permute.xlu0 %3211  ;;  %2856 = vmatprep.subr.msk.bf16.mxu1 %vm4450_vm5, %v2854_v23 }
  0xd7   : > { %v3214_v55 = vunpack.i.h.bf16 %v3212_v36  ;;  %v3213_v54 = vunpack.i.l.bf16 %v3212_v36  ;;  %3506 = vrot.lane.b32.xlu1 %v3505_v11, %s3575_s23  ;;  %v2147_v40 = vsel %vm760_vm4, %v2115_v20, %v3218_v22  ;;  %v2148_v60 = vsel %vm760_vm4, %v2116_v21, %v3219_v1  ;;  %v3540_v11 = vld [vmem:[%s3627_s22 + $0x18] sm:$0xff] }
  0xd8   : > { %3501 = vrot.lane.b32.xlu0 %v3500_v44, %s3575_s23  ;;  %2819 = vmatmul.mubr.msk.f32.vlgmr.msra.gmra.mrb[0].mxu0 %vm1309_vm2, %v5465_v32  ;;  %v2950_v12 = vpack.c.bf16 %v2148_v60, %v2147_v40  ;;  %v3227_v0 = vpop.permute.xlu1 %3226  ;;  %v1243_v50 = vsel %vm727_vm3, %v3540_v11, %v3203_v26 }
  0xd9   : > { %2852 = vmatprep.mubr.msk.f32.mxu0 %vm1309_vm2, %v5006_v17  ;;  %v3229_v63 = vunpack.i.h.bf16 %v3227_v0  ;;  %v3228_v8 = vunpack.i.l.bf16 %v3227_v0  ;;  %v2100_v52 = vsel %vm727_vm3, %v3538_v9, %v3214_v55  ;;  %v2099_v57 = vsel %vm727_vm3, %v4590_v33, %v3213_v54 }
  0xda   : > { %v3222_v37 = vpop.permute.xlu0 %3221  ;;  %2952 = vmatprep.subr.msk.bf16.mxu0 %vm4450_vm5, %v2950_v12 }
  0xdb   : > { %v3224_v2 = vunpack.i.h.bf16 %v3222_v37  ;;  %v3223_v29 = vunpack.i.l.bf16 %v3222_v37  ;;  %v2131_v59 = vsel %vm760_vm4, %v2099_v57, %v3228_v8  ;;  %v2132_v25 = vsel %vm760_vm4, %v2100_v52, %v3229_v63 }
  0xdc   : > { %2340 = vperm.xlu0 %3510, %v2337_v5   ;;  %v2953_v27 = vpack.c.bf16 %v2132_v25, %v2131_v59  ;;  %v3237_v44 = vpop.permute.xlu1 %3236 }
  0xdd   : > { %v1275_v19 = vsel %vm760_vm4, %v1243_v50, %v3223_v29  ;;  %v1276_v13 = vsel %vm760_vm4, %v1244_v6, %v3224_v2  ;;  %v3239_v54 = vunpack.i.h.bf16 %v3237_v44  ;;  %v3238_v43 = vunpack.i.l.bf16 %v3237_v44 }
  0xde   : > { %v3232_v61 = vpop.permute.xlu0 %3231  ;;  %v2857_v23 = vpack.c.bf16 %v1276_v13, %v1275_v19  ;;  %2955 = vmatpush3.bf16.xpose.msk.msra.mxu0 %vm4450_vm5, %v2953_v27 }
  0xdf   : > { %v3234_v21 = vunpack.i.h.bf16 %v3232_v61  ;;  %v3233_v1 = vunpack.i.l.bf16 %v3232_v61  ;;  %v2118_v8 = vsel %vm727_vm3, %v4671_v3, %v3239_v54  ;;  %v2117_v37 = vsel %vm727_vm3, %v4676_v10, %v3238_v43 }
  0xe0   : > { %2859 = vmatpush3.bf16.xpose.msk.msra.mxu1 %vm4450_vm5, %v2857_v23  ;;  %v3247_v22 = vpop.permute.xlu1 %3246 }
  0xe1   : > { %v3249_v36 = vunpack.i.h.bf16 %v3247_v22  ;;  %v3248_v20 = vunpack.i.l.bf16 %v3247_v22  ;;  %v1262_v26 = vsel %vm727_vm3, %v3536_v28, %v3234_v21  ;;  %v1261_v40 = vsel %vm727_vm3, %v3537_v34, %v3233_v1 }
  0xe2   : > { %v3242_v55 = vpop.permute.xlu0 %3241 }
  0xe3   : > { %v1293_v60 = vsel %vm760_vm4, %v1261_v40, %v3248_v20  ;;  %v1294_v32 = vsel %vm760_vm4, %v1262_v26, %v3249_v36  ;;  %v3244_v28 = vunpack.i.h.bf16 %v3242_v55  ;;  %v3243_v34 = vunpack.i.l.bf16 %v3242_v55 }
  0xe4   : > { %v2860_v12 = vpack.c.bf16 %v1294_v32, %v1293_v60  ;;  %v3257_v0 = vpop.permute.xlu1 %3256 }
  0xe5   : > { %v3259_v51 = vunpack.i.h.bf16 %v3257_v0  ;;  %v3258_v5 = vunpack.i.l.bf16 %v3257_v0  ;;  %v1246_v13 = vsel %vm727_vm3, %v3538_v9, %v3244_v28  ;;  %v1245_v61 = vsel %vm727_vm3, %v4590_v33, %v3243_v34 }
  0xe6   : > { %v3252_v63 = vpop.permute.xlu0 %3251  ;;  %2862 = vmatprep.subr.msk.bf16.mxu1 %vm4450_vm5, %v2860_v12 }
  0xe7   : > { %v3254_v52 = vunpack.i.h.bf16 %v3252_v63  ;;  %v3253_v57 = vunpack.i.l.bf16 %v3252_v63  ;;  %v2149_v2 = vsel %vm760_vm4, %v2117_v37, %v3258_v5  ;;  %v2150_v29 = vsel %vm760_vm4, %v2118_v8, %v3259_v51 }
  0xe8   : > { %v2956_v14 = vpack.c.bf16 %v2150_v29, %v2149_v2  ;;  %v3267_v6 = vpop.permute.xlu1 %3266 }
  0xe9   : > { %v3269_v11 = vunpack.i.h.bf16 %v3267_v6  ;;  %v3268_v50 = vunpack.i.l.bf16 %v3267_v6  ;;  %v2102_v25 = vsel %vm727_vm3, %v4657_v42, %v3254_v52  ;;  %v2101_v27 = vsel %vm727_vm3, %v4662_v15, %v3253_v57 }
  0xea   : > { %v3262_v59 = vpop.permute.xlu0 %3261  ;;  %2958 = vmatprep.subr.msk.bf16.mxu0 %vm4450_vm5, %v2956_v14 }
  0xeb   : > { %v3264_v44 = vunpack.i.h.bf16 %v3262_v59  ;;  %v3263_v19 = vunpack.i.l.bf16 %v3262_v59  ;;  %v2133_v23 = vsel %vm760_vm4, %v2101_v27, %v3268_v50  ;;  %v2134_v21 = vsel %vm760_vm4, %v2102_v25, %v3269_v11 }
  0xec   : > { %v2959_v1 = vpack.c.bf16 %v2134_v21, %v2133_v23  ;;  %v3277_v20 = vpop.permute.xlu1 %3276 }
  0xed   : > { %v1277_v22 = vsel %vm760_vm4, %v1245_v61, %v3263_v19  ;;  %v1278_v36 = vsel %vm760_vm4, %v1246_v13, %v3264_v44  ;;  %v3279_v32 = vunpack.i.h.bf16 %v3277_v20  ;;  %v3278_v12 = vunpack.i.l.bf16 %v3277_v20 }
  0xee   : > { %v2863_v55 = vpack.c.bf16 %v1278_v36, %v1277_v22  ;;  %v3272_v54 = vpop.permute.xlu0 %3271  ;;  %2961 = vmatpush3.bf16.xpose.msk.msra.mxu0 %vm4450_vm5, %v2959_v1 }
  0xef   : > { %v3274_v43 = vunpack.i.h.bf16 %v3272_v54  ;;  %v3273_v26 = vunpack.i.l.bf16 %v3272_v54  ;;  %v2120_v34 = vsel %vm727_vm3, %v4746_v39, %v3279_v32  ;;  %v2119_v2 = vsel %vm727_vm3, %v4751_v62, %v3278_v12 }
  0xf0   : > { %2865 = vmatpush3.bf16.xpose.msk.msra.mxu1 %vm4450_vm5, %v2863_v55  ;;  %v3287_v33 = vpop.permute.xlu1 %3286 }
  0xf1   : > { %v3289_v9 = vunpack.i.h.bf16 %v3287_v33  ;;  %v3288_v40 = vunpack.i.l.bf16 %v3287_v33  ;;  %v1264_v0 = vsel %vm727_vm3, %v4671_v3, %v3274_v43  ;;  %v1263_v51 = vsel %vm727_vm3, %v4676_v10, %v3273_v26 }
  0xf2   : > { %v3282_v60 = vpop.permute.xlu0 %3281 }
  0xf3   : > { %v1295_v5 = vsel %vm760_vm4, %v1263_v51, %v3288_v40  ;;  %v1296_v63 = vsel %vm760_vm4, %v1264_v0, %v3289_v9  ;;  %v3284_v10 = vunpack.i.h.bf16 %v3282_v60  ;;  %v3283_v14 = vunpack.i.l.bf16 %v3282_v60 }
  0xf4   : > { %v2866_v8 = vpack.c.bf16 %v1296_v63, %v1295_v5  ;;  %v3297_v37 = vpop.permute.xlu1 %3296 }
  0xf5   : > { %v3299_v52 = vunpack.i.h.bf16 %v3297_v37  ;;  %v3298_v57 = vunpack.i.l.bf16 %v3297_v37  ;;  %v1248_v21 = vsel %vm727_vm3, %v4657_v42, %v3284_v10  ;;  %v1247_v1 = vsel %vm727_vm3, %v4662_v15, %v3283_v14 }
  0xf6   : > { %v3292_v28 = vpop.permute.xlu0 %3291  ;;  %2868 = vmatprep.subr.msk.bf16.mxu1 %vm4450_vm5, %v2866_v8 }
  0xf7   : > { %v3294_v29 = vunpack.i.h.bf16 %v3292_v28  ;;  %v3293_v3 = vunpack.i.l.bf16 %v3292_v28  ;;  %v2151_v6 = vsel %vm760_vm4, %v2119_v2, %v3298_v57  ;;  %v2152_v11 = vsel %vm760_vm4, %v2120_v34, %v3299_v52 }
  0xf8   : > { %v2962_v50 = vpack.c.bf16 %v2152_v11, %v2151_v6  ;;  %v3307_v59 = vpop.permute.xlu1 %3306 }
  0xf9   : > { %v3309_v25 = vunpack.i.h.bf16 %v3307_v59  ;;  %v3308_v27 = vunpack.i.l.bf16 %v3307_v59  ;;  %v2104_v19 = vsel %vm727_vm3, %v4732_v41, %v3294_v29  ;;  %v2103_v13 = vsel %vm727_vm3, %v4737_v31, %v3293_v3 }
  0xfa   : > { %v3302_v44 = vpop.permute.xlu0 %3301  ;;  %2964 = vmatprep.subr.msk.bf16.mxu0 %vm4450_vm5, %v2962_v50 }
  0xfb   : > { %v3304_v61 = vunpack.i.h.bf16 %v3302_v44  ;;  %v3303_v23 = vunpack.i.l.bf16 %v3302_v44  ;;  %v2135_v22 = vsel %vm760_vm4, %v2103_v13, %v3308_v27  ;;  %v2136_v36 = vsel %vm760_vm4, %v2104_v19, %v3309_v25 }
  0xfc   : > { %v2965_v20 = vpack.c.bf16 %v2136_v36, %v2135_v22  ;;  %v3317_v43 = vpop.permute.xlu1 %3316 }
  0xfd   : > { %v1279_v55 = vsel %vm760_vm4, %v1247_v1, %v3303_v23  ;;  %v1280_v54 = vsel %vm760_vm4, %v1248_v21, %v3304_v61  ;;  %v3319_v12 = vunpack.i.h.bf16 %v3317_v43  ;;  %v3318_v0 = vunpack.i.l.bf16 %v3317_v43 }
  0xfe   : > { %v2869_v26 = vpack.c.bf16 %v1280_v54, %v1279_v55  ;;  %v3312_v33 = vpop.permute.xlu0 %3311  ;;  %2967 = vmatpush3.bf16.xpose.msk.msra.mxu0 %vm4450_vm5, %v2965_v20 }
  0xff   : > { %v3314_v9 = vunpack.i.h.bf16 %v3312_v33  ;;  %v3313_v40 = vunpack.i.l.bf16 %v3312_v33  ;;  %v2122_v2 = vsel %vm727_vm3, %v4842_v7, %v3319_v12  ;;  %v2121_v29 = vsel %vm727_vm3, %v4847_v53, %v3318_v0 }
 0x100   : > { %2871 = vmatpush3.bf16.xpose.msk.msra.mxu1 %vm4450_vm5, %v2869_v26  ;;  %v3327_v42 = vpop.permute.xlu1 %3326 }
 0x101   : > { %v3329_v15 = vunpack.i.h.bf16 %v3327_v42  ;;  %v3328_v60 = vunpack.i.l.bf16 %v3327_v42  ;;  %v1266_v51 = vsel %vm727_vm3, %v4746_v39, %v3314_v9  ;;  %v1265_v5 = vsel %vm727_vm3, %v4751_v62, %v3313_v40 }
 0x102   : > { %v3322_v32 = vpop.permute.xlu0 %3321 }
 0x103   : > { %v1297_v63 = vsel %vm760_vm4, %v1265_v5, %v3328_v60  ;;  %v1298_v8 = vsel %vm760_vm4, %v1266_v51, %v3329_v15  ;;  %v3324_v62 = vunpack.i.h.bf16 %v3322_v32  ;;  %v3323_v10 = vunpack.i.l.bf16 %v3322_v32 }
 0x104   : > { %v2872_v37 = vpack.c.bf16 %v1298_v8, %v1297_v63  ;;  %v3337_v52 = vpop.permute.xlu1 %3336 }
 0x105   : > { %v3339_v57 = vunpack.i.h.bf16 %v3337_v52  ;;  %v3338_v28 = vunpack.i.l.bf16 %v3337_v52  ;;  %v1250_v23 = vsel %vm727_vm3, %v4732_v41, %v3324_v62  ;;  %v1249_v21 = vsel %vm727_vm3, %v4737_v31, %v3323_v10 }
 0x106   : > { %v3332_v34 = vpop.permute.xlu0 %3331  ;;  %2874 = vmatprep.subr.msk.bf16.mxu1 %vm4450_vm5, %v2872_v37 }
 0x107   : > { %v3334_v3 = vunpack.i.h.bf16 %v3332_v34  ;;  %v3333_v39 = vunpack.i.l.bf16 %v3332_v34  ;;  %v2153_v14 = vsel %vm760_vm4, %v2121_v29, %v3338_v28  ;;  %v2154_v6 = vsel %vm760_vm4, %v2122_v2, %v3339_v57 }
 0x108   : > { %v2968_v11 = vpack.c.bf16 %v2154_v6, %v2153_v14  ;;  %v3347_v50 = vpop.permute.xlu1 %3346 }
 0x109   : > { %v3349_v59 = vunpack.i.h.bf16 %v3347_v50  ;;  %v3348_v25 = vunpack.i.l.bf16 %v3347_v50  ;;  %v2106_v44 = vsel %vm727_vm3, %v4825_v58, %v3334_v3  ;;  %v2105_v19 = vsel %vm727_vm3, %v4830_v48, %v3333_v39 }
 0x10a   : > { %v3342_v27 = vpop.permute.xlu0 %3341  ;;  %2970 = vmatprep.subr.msk.bf16.mxu0 %vm4450_vm5, %v2968_v11 }
 0x10b   : > { %v3344_v13 = vunpack.i.h.bf16 %v3342_v27  ;;  %v3343_v61 = vunpack.i.l.bf16 %v3342_v27  ;;  %v2137_v1 = vsel %vm760_vm4, %v2105_v19, %v3348_v25  ;;  %v2138_v22 = vsel %vm760_vm4, %v2106_v44, %v3349_v59 }
 0x10c   : > { %v2971_v36 = vpack.c.bf16 %v2138_v22, %v2137_v1 }
 0x10d   : > { %v1281_v20 = vsel %vm760_vm4, %v1249_v21, %v3343_v61  ;;  %v1282_v55 = vsel %vm760_vm4, %v1250_v23, %v3344_v13  ;;  %v3357_v54 = vpop.permute.xlu1 %3356 }
 0x10e   : > { %v2875_v43 = vpack.c.bf16 %v1282_v55, %v1281_v20  ;;  %v3352_v26 = vpop.permute.xlu0 %3351  ;;  %2973 = vmatpush3.bf16.xpose.msk.msra.mxu0 %vm4450_vm5, %v2971_v36  ;;  %v3359_v15 = vunpack.i.h.bf16 %v3357_v54  ;;  %v3358_v60 = vunpack.i.l.bf16 %v3357_v54 }
 0x10f   : > { %v3354_v33 = vunpack.i.h.bf16 %v3352_v26  ;;  %v3353_v9 = vunpack.i.l.bf16 %v3352_v26 }
 0x110   : > { %2877 = vmatpush3.bf16.xpose.msk.msra.mxu1 %vm4450_vm5, %v2875_v43  ;;  %v2124_v57 = vsel %vm727_vm3, %v4915_v45, %v3359_v15  ;;  %v2123_v28 = vsel %vm727_vm3, %v4920_v30, %v3358_v60 }
 0x111   : > { %v3367_v41 = vpop.permute.xlu1 %3366  ;;  %v1268_v32 = vsel %vm727_vm3, %v4842_v7, %v3354_v33  ;;  %v1267_v12 = vsel %vm727_vm3, %v4847_v53, %v3353_v9 }
 0x112   : > { %v3369_v31 = vunpack.i.h.bf16 %v3367_v41  ;;  %v3368_v40 = vunpack.i.l.bf16 %v3367_v41  ;;  %v3362_v42 = vpop.permute.xlu0 %3361 }
 0x113   : > { %v3364_v53 = vunpack.i.h.bf16 %v3362_v42  ;;  %v3363_v2 = vunpack.i.l.bf16 %v3362_v42 }
 0x114   : > { %v1299_v0 = vsel %vm760_vm4, %v1267_v12, %v3368_v40  ;;  %v1300_v51 = vsel %vm760_vm4, %v1268_v32, %v3369_v31 }
 0x115   : > { %v2878_v5 = vpack.c.bf16 %v1300_v51, %v1299_v0  ;;  %v3377_v63 = vpop.permute.xlu1 %3376  ;;  %v1252_v27 = vsel %vm727_vm3, %v4825_v58, %v3364_v53  ;;  %v1251_v44 = vsel %vm727_vm3, %v4830_v48, %v3363_v2 }
 0x116   : > { %v3379_v8 = vunpack.i.h.bf16 %v3377_v63  ;;  %v3378_v37 = vunpack.i.l.bf16 %v3377_v63  ;;  %v3372_v52 = vpop.permute.xlu0 %3371 }
 0x117   : > { %v3374_v34 = vunpack.i.h.bf16 %v3372_v52  ;;  %v3373_v7 = vunpack.i.l.bf16 %v3372_v52  ;;  %2880 = vmatprep.subr.msk.bf16.mxu1 %vm4450_vm5, %v2878_v5 }
 0x118   : > { %v2155_v29 = vsel %vm760_vm4, %v2123_v28, %v3378_v37  ;;  %v2156_v3 = vsel %vm760_vm4, %v2124_v57, %v3379_v8  ;;  %v5181_v28 = vld [vmem:[%s3627_s22 + $0xb0] sm:$0xff] }
 0x119   : > { %v2974_v39 = vpack.c.bf16 %v2156_v3, %v2155_v29  ;;  %v3387_v62 = vpop.permute.xlu1 %3386  ;;  %v2108_v11 = vsel %vm727_vm3, %v4898_v18, %v3374_v34  ;;  %v2107_v50 = vsel %vm727_vm3, %v4903_v35, %v3373_v7  ;;  %v5186_v34 = vld [vmem:[%s3627_s22 + $0xa8] sm:$0xff]  ;;  %v3543_v29 = vld [vmem:[%s3627_s22 + $0x98] sm:$0xff] }
 0x11a   : > { %v3389_v10 = vunpack.i.h.bf16 %v3387_v62  ;;  %v3388_v14 = vunpack.i.l.bf16 %v3387_v62  ;;  %v3382_v6 = vpop.permute.xlu0 %3381 }
 0x11b   : > { %v3384_v59 = vunpack.i.h.bf16 %v3382_v6  ;;  %v3383_v25 = vunpack.i.l.bf16 %v3382_v6  ;;  %2976 = vmatprep.subr.msk.bf16.mxu0 %vm4450_vm5, %v2974_v39  ;;  %v3544_v39 = vld [vmem:[%s3627_s22 + $0x90] sm:$0xff] }
 0x11c   : > { %v2139_v19 = vsel %vm760_vm4, %v2107_v50, %v3388_v14  ;;  %v2140_v13 = vsel %vm760_vm4, %v2108_v11, %v3389_v10 }
 0x11d   : > { %v2977_v61 = vpack.c.bf16 %v2140_v13, %v2139_v19  ;;  %v1283_v18 = vsel %vm760_vm4, %v1251_v44, %v3383_v25  ;;  %v1284_v35 = vsel %vm760_vm4, %v1252_v27, %v3384_v59  ;;  %v3397_v23 = vpop.permute.xlu1 %3396 }
 0x11e   : > { %v2881_v21 = vpack.c.bf16 %v1284_v35, %v1283_v18  ;;  %v3392_v1 = vpop.permute.xlu0 %3391  ;;  %v3399_v54 = vunpack.i.h.bf16 %v3397_v23  ;;  %v3398_v43 = vunpack.i.l.bf16 %v3397_v23 }
 0x11f   : > { %v3394_v22 = vunpack.i.h.bf16 %v3392_v1  ;;  %v3393_v36 = vunpack.i.l.bf16 %v3392_v1  ;;  %2979 = vmatpush3.bf16.xpose.msk.msra.mxu0 %vm4450_vm5, %v2977_v61  ;;  %v3545_v1 = vld [vmem:[%s3627_s22 + $0x170] sm:$0xff] }
 0x120   : > { %2883 = vmatpush3.bf16.xpose.msk.msra.mxu1 %vm4450_vm5, %v2881_v21  ;;  %v2126_v32 = vsel %vm727_vm3, %v4960_v56, %v3399_v54 }
 0x121   : > { %v3407_v58 = vpop.permute.xlu1 %3406  ;;  %v1270_v26 = vsel %vm727_vm3, %v4915_v45, %v3394_v22  ;;  %v1269_v33 = vsel %vm727_vm3, %v4920_v30, %v3393_v36  ;;  %v2125_v45 = vsel %vm727_vm3, %v4965_v24, %v3398_v43  ;;  %v3546_v36 = vld [vmem:[%s3627_s22 + $0x168] sm:$0xff] }
 0x122   : > { %v3409_v48 = vunpack.i.h.bf16 %v3407_v58  ;;  %v3408_v20 = vunpack.i.l.bf16 %v3407_v58  ;;  %v3402_v55 = vpop.permute.xlu0 %3401 }
 0x123   : > { %v3404_v30 = vunpack.i.h.bf16 %v3402_v55  ;;  %v3403_v51 = vunpack.i.l.bf16 %v3402_v55 }
 0x124   : > { %v1301_v9 = vsel %vm760_vm4, %v1269_v33, %v3408_v20  ;;  %v1302_v41 = vsel %vm760_vm4, %v1270_v26, %v3409_v48 }
 0x125   : > { %v2884_v31 = vpack.c.bf16 %v1302_v41, %v1301_v9  ;;  %v3417_v40 = vpop.permute.xlu1 %3416  ;;  %v1254_v3 = vsel %vm727_vm3, %v3543_v29, %v3404_v30  ;;  %v1253_v62 = vsel %vm727_vm3, %v3544_v39, %v3403_v51  ;;  %v3547_v9 = vld [vmem:[%s3627_s22 + $0x188] sm:$0xff] }
 0x126   : > { %v3419_v42 = vunpack.i.h.bf16 %v3417_v40  ;;  %v3418_v15 = vunpack.i.l.bf16 %v3417_v40  ;;  %v3412_v60 = vpop.permute.xlu0 %3411 }
 0x127   : > { %v3414_v12 = vunpack.i.h.bf16 %v3412_v60  ;;  %v3413_v0 = vunpack.i.l.bf16 %v3412_v60  ;;  %2886 = vmatprep.subr.msk.bf16.mxu1 %vm4450_vm5, %v2884_v31  ;;  %v3548_v31 = vld [vmem:[%s3627_s22 + $0x180] sm:$0xff] }
 0x128   : > { %v2157_v5 = vsel %vm760_vm4, %v2125_v45, %v3418_v15  ;;  %v2158_v63 = vsel %vm760_vm4, %v2126_v32, %v3419_v42 }
 0x129   : > { %v2980_v8 = vpack.c.bf16 %v2158_v63, %v2157_v5  ;;  %v3427_v37 = vpop.permute.xlu1 %3426  ;;  %v2110_v24 = vsel %vm727_vm3, %v5181_v28, %v3414_v12  ;;  %v2109_v7 = vsel %vm727_vm3, %v5186_v34, %v3413_v0 }
 0x12a   : > { %v3429_v56 = vunpack.i.h.bf16 %v3427_v37  ;;  %v3428_v52 = vunpack.i.l.bf16 %v3427_v37  ;;  %v3422_v57 = vpop.permute.xlu0 %3421 }
 0x12b   : > { %v3424_v53 = vunpack.i.h.bf16 %v3422_v57  ;;  %v3423_v2 = vunpack.i.l.bf16 %v3422_v57  ;;  %2982 = vmatprep.subr.msk.bf16.mxu0 %vm4450_vm5, %v2980_v8  ;;  %v3549_v8 = vld [vmem:[%s3627_s22 + $0xc8] sm:$0xff] }
 0x12c   : > { %v2141_v10 = vsel %vm760_vm4, %v2109_v7, %v3428_v52  ;;  %v2142_v14 = vsel %vm760_vm4, %v2110_v24, %v3429_v56  ;;  %v3550_v56 = vld [vmem:[%s3627_s22 + $0xc0] sm:$0xff] }
 0x12d   : > { %v2983_v6 = vpack.c.bf16 %v2142_v14, %v2141_v10  ;;  %v1285_v11 = vsel %vm760_vm4, %v1253_v62, %v3423_v2  ;;  %v1286_v50 = vsel %vm760_vm4, %v1254_v3, %v3424_v53  ;;  %v3437_v59 = vpop.permute.xlu1 %3436 }
 0x12e   : > { %v2887_v25 = vpack.c.bf16 %v1286_v50, %v1285_v11  ;;  %v3432_v27 = vpop.permute.xlu0 %3431  ;;  %v3439_v23 = vunpack.i.h.bf16 %v3437_v59  ;;  %v3438_v21 = vunpack.i.l.bf16 %v3437_v59 }
 0x12f   : > { %v3434_v44 = vunpack.i.h.bf16 %v3432_v27  ;;  %v3433_v19 = vunpack.i.l.bf16 %v3432_v27  ;;  %2985 = vmatpush3.bf16.xpose.msk.msra.mxu0 %vm4450_vm5, %v2983_v6 }
 0x130   : > { %2889 = vmatpush3.bf16.xpose.msk.msra.mxu1 %vm4450_vm5, %v2887_v25  ;;  %v2128_v41 = vsel %vm727_vm3, %v3547_v9, %v3439_v23  ;;  %v2127_v40 = vsel %vm727_vm3, %v3548_v31, %v3438_v21 }
 0x131   : > { %v3447_v13 = vpop.permute.xlu1 %3446  ;;  %v1272_v22 = vsel %vm727_vm3, %v3545_v1, %v3434_v44  ;;  %v1271_v58 = vsel %vm727_vm3, %v3546_v36, %v3433_v19 }
 0x132   : > { %v3449_v61 = vunpack.i.h.bf16 %v3447_v13  ;;  %v3448_v18 = vunpack.i.l.bf16 %v3447_v13  ;;  %v3442_v35 = vpop.permute.xlu0 %3441 }
 0x133   : > { %v3444_v60 = vunpack.i.h.bf16 %v3442_v35  ;;  %v3443_v32 = vunpack.i.l.bf16 %v3442_v35 }
 0x134   : > { %v1303_v48 = vsel %vm760_vm4, %v1271_v58, %v3448_v18  ;;  %v1304_v20 = vsel %vm760_vm4, %v1272_v22, %v3449_v61 }
 0x135   : > { %v2890_v55 = vpack.c.bf16 %v1304_v20, %v1303_v48  ;;  %v3457_v54 = vpop.permute.xlu1 %3456  ;;  %v1256_v7 = vsel %vm727_vm3, %v5181_v28, %v3444_v60  ;;  %v1255_v53 = vsel %vm727_vm3, %v5186_v34, %v3443_v32 }
 0x136   : > { %v3459_v43 = vunpack.i.h.bf16 %v3457_v54  ;;  %v3458_v26 = vunpack.i.l.bf16 %v3457_v54  ;;  %v3452_v33 = vpop.permute.xlu0 %3451 }
 0x137   : > { %v3454_v42 = vunpack.i.h.bf16 %v3452_v33  ;;  %v3453_v15 = vunpack.i.l.bf16 %v3452_v33  ;;  %2892 = vmatprep.subr.msk.bf16.mxu1 %vm4450_vm5, %v2890_v55 }
 0x138   : > { %v2159_v45 = vsel %vm760_vm4, %v2127_v40, %v3458_v26  ;;  %v2160_v12 = vsel %vm760_vm4, %v2128_v41, %v3459_v43 }
 0x139   : > { %v2986_v0 = vpack.c.bf16 %v2160_v12, %v2159_v45  ;;  %v3467_v30 = vpop.permute.xlu1 %3466  ;;  %v2112_v37 = vsel %vm727_vm3, %v3549_v8, %v3454_v42  ;;  %v2111_v52 = vsel %vm727_vm3, %v3550_v56, %v3453_v15 }
 0x13a   : > { %v3469_v51 = vunpack.i.h.bf16 %v3467_v30  ;;  %v3468_v5 = vunpack.i.l.bf16 %v3467_v30  ;;  %v3462_v63 = vpop.permute.xlu0 %3461 }
 0x13b   : > { %v3464_v57 = vunpack.i.h.bf16 %v3462_v63  ;;  %v3463_v24 = vunpack.i.l.bf16 %v3462_v63  ;;  %2988 = vmatprep.subr.msk.bf16.mxu0 %vm4450_vm5, %v2986_v0 }
 0x13c   : > { %v2143_v2 = vsel %vm760_vm4, %v2111_v52, %v3468_v5  ;;  %v2144_v29 = vsel %vm760_vm4, %v2112_v37, %v3469_v51 }
 0x13d   : > { %v2989_v3 = vpack.c.bf16 %v2144_v29, %v2143_v2  ;;  %v1287_v39 = vsel %vm760_vm4, %v1255_v53, %v3463_v24  ;;  %v1288_v62 = vsel %vm760_vm4, %v1256_v7, %v3464_v57  ;;  %v3477_v10 = vpop.permute.xlu1 %3476 }
 0x13e   : > { %v2893_v14 = vpack.c.bf16 %v1288_v62, %v1287_v39  ;;  %v3472_v6 = vpop.permute.xlu0 %3471  ;;  %v3479_v27 = vunpack.i.h.bf16 %v3477_v10  ;;  %v3478_v44 = vunpack.i.l.bf16 %v3477_v10 }
 0x13f   : > { %v3474_v11 = vunpack.i.h.bf16 %v3472_v6  ;;  %v3473_v50 = vunpack.i.l.bf16 %v3472_v6  ;;  %2991 = vmatpush3.bf16.xpose.msk.msra.mxu0 %vm4450_vm5, %v2989_v3 }
 0x140   : > { %2895 = vmatpush3.bf16.xpose.msk.msra.mxu1 %vm4450_vm5, %v2893_v14  ;;  %v2130_v36 = vsel %vm727_vm3, %v4776_v38, %v3479_v27  ;;  %v2129_v58 = vsel %vm727_vm3, %v4773_v47, %v3478_v44 }
 0x141   : > { %v3487_v28 = vpop.permute.xlu1 %3486  ;;  %v1274_v19 = vsel %vm727_vm3, %v3547_v9, %v3474_v11  ;;  %v1273_v13 = vsel %vm727_vm3, %v3548_v31, %v3473_v50 }
 0x142   : > { %v3489_v34 = vunpack.i.h.bf16 %v3487_v28  ;;  %v3488_v59 = vunpack.i.l.bf16 %v3487_v28  ;;  %v3482_v25 = vpop.permute.xlu0 %3481 }
 0x143   : > { %v3484_v55 = vunpack.i.h.bf16 %v3482_v25  ;;  %v3483_v54 = vunpack.i.l.bf16 %v3482_v25 }
 0x144   : > { %v1305_v61 = vsel %vm760_vm4, %v1273_v13, %v3488_v59  ;;  %v1306_v18 = vsel %vm760_vm4, %v1274_v19, %v3489_v34 }
 0x145   : > { %v2896_v35 = vpack.c.bf16 %v1306_v18, %v1305_v61  ;;  %v3497_v23 = vpop.permute.xlu1 %3496  ;;  %v1258_v60 = vsel %vm727_vm3, %v3549_v8, %v3484_v55  ;;  %v1257_v32 = vsel %vm727_vm3, %v3550_v56, %v3483_v54 }
 0x146   : > { %v3499_v21 = vunpack.i.h.bf16 %v3497_v23  ;;  %v3498_v1 = vunpack.i.l.bf16 %v3497_v23  ;;  %v3492_v22 = vpop.permute.xlu0 %3491 }
 0x147   : > { %v3494_v48 = vunpack.i.h.bf16 %v3492_v22  ;;  %v3493_v20 = vunpack.i.l.bf16 %v3492_v22  ;;  %2898 = vmatprep.subr.msk.bf16.mxu1 %vm4450_vm5, %v2896_v35 }
 0x148   : > { %v2161_v43 = vsel %vm760_vm4, %v2129_v58, %v3498_v1  ;;  %v2162_v26 = vsel %vm760_vm4, %v2130_v36, %v3499_v21 }
 0x149   : > { %v2992_v33 = vpack.c.bf16 %v2162_v26, %v2161_v43  ;;  %v3507_v9 = vpop.permute.xlu1 %3506  ;;  %v2114_v38 = vsel %vm727_vm3, %v4912_v49, %v3494_v48  ;;  %v2113_v47 = vsel %vm727_vm3, %v4909_v16, %v3493_v20 }
 0x14a   : > { %v3509_v41 = vunpack.i.h.bf16 %v3507_v9  ;;  %v3508_v31 = vunpack.i.l.bf16 %v3507_v9  ;;  %v3502_v40 = vpop.permute.xlu0 %3501 }
 0x14b   : > { %v3504_v42 = vunpack.i.h.bf16 %v3502_v40  ;;  %v3503_v15 = vunpack.i.l.bf16 %v3502_v40  ;;  %2994 = vmatprep.subr.msk.bf16.mxu0 %vm4450_vm5, %v2992_v33 }
 0x14c   : > { %v2145_v45 = vsel %vm760_vm4, %v2113_v47, %v3508_v31  ;;  %v2146_v12 = vsel %vm760_vm4, %v2114_v38, %v3509_v41 }
 0x14d   : > { %v2995_v0 = vpack.c.bf16 %v2146_v12, %v2145_v45  ;;  %v1289_v49 = vsel %vm760_vm4, %v1257_v32, %v3503_v15  ;;  %v1290_v16 = vsel %vm760_vm4, %v1258_v60, %v3504_v42 }
 0x14e   : > { %v2899_v30 = vpack.c.bf16 %v1290_v16, %v1289_v49 }
 0x14f   : > { %2997 = vmatpush3.bf16.xpose.msk.msra.mxu0 %vm4450_vm5, %v2995_v0 }
 0x150   : > { %2901 = vmatpush3.bf16.xpose.msk.msra.mxu1 %vm4450_vm5, %v2899_v30 }
 0x156   : > { %2853 = vmatmul.mubr.msk.f32.vlgmr.msra.gmra.mrb[0].mxu0 %vm1309_vm2, %v5006_v17 }
 0x157   : > { %2785 = vmatmul.mubr.msk.f32.vlgmr.msra.gmra.mrb[0].mxu1 %vm1309_vm2, %v4984_v46 }
 0x15b   : > { %v2341_v5 = vpop.permute.xlu0 %2340 }
 0x229   : > { %v2330_v51 = vpop.f32.mrb[0].mxu0 }
 0x22a   : > { %v1475_v63 = vpop.f32.mrb[0].mxu1  ;;  %v2332_v8 = vpop.f32.mrb[1].mxu0 }
 0x22b   : > { %v2998_v37 = vadd.f32 %v2330_v51, %v1475_v63  ;;  %v1477_v56 = vpop.f32.mrb[1].mxu1 }
 0x22c   : > { %v2999_v52 = vadd.f32 %v2332_v8, %v1477_v56 }
 0x22d   : > { %v2343_v4 = vadd.f32 %v2998_v37, %v2341_v5 }
 0x22e   : > { %v2344_v57 = vadd.f32 %v2999_v52, %v2341_v5 }
 0x22f   : > { %2353 = vst [vmem:[%s267_s10] sm:$0xff] %v2343_v4  ;;  %v2348_v17 = vmul.f32 %v2343_v4, %v2343_v4 }
 0x230   : > { %2354 = vst [vmem:[%s267_s10 + $0x8] sm:$0xff] %v2344_v57  ;;  %v2345_v24 = vadd.f32 %v2344_v57, %v2343_v4  ;;  %v2349_v46 = vmul.f32 %v2344_v57, %v2344_v57 }
 0x232   : > { %2346 = vadd.xlane.f32.xlu1 %v2345_v24  ;;  %v2350_v7 = vadd.f32 %v2349_v46, %v2348_v17 }
 0x234   : > { %2351 = vadd.xlane.f32.xlu0 %v2350_v7 }
 0x2bf   : > { %v2347_v53 = vpop.xlane.xlu1 %2346 }
 0x2c0   : > { %v2355_v2 = vmul.f32 0.00390625, %v2347_v53 }
 0x2c1   : > { %v2352_v29 = vpop.xlane.xlu0 %2351 }
 0x2c2   : > { %v2356_v3 = vmul.f32 0.00390625, %v2352_v29  ;;  %v2357_v39 = vmul.f32 %v2355_v2, %v2355_v2  ;;  %v2364_v6 = vsub.f32 %v2343_v4, %v2355_v2  ;;  %v2365_v11 = vsub.f32 %v2344_v57, %v2355_v2 }
 0x2c4   : > { %v2358_v62 = vsub.f32 %v2356_v3, %v2357_v39 }
 0x2c6   : > { %v2359_v10 = vmax.f32 %v2358_v62, 0.0 }
 0x2c8   : > { %v2360_v14 = vadd.f32 1e-05, %v2359_v10 }
 0x2ca   : > { %3511 = vrsqrt.f32 %v2360_v14 }
 0x2d4   : > { %v3512_v50 = vpop.eup %3511 }
 0x2d5   : > { %v2366_v28 = vmul.f32 %v3512_v50, %v2364_v6  ;;  %v2367_v34 = vmul.f32 %v3512_v50, %v2365_v11 }
 0x2d7   : > { %v2368_v59 = vmax.f32 %v2366_v28, 0.0  ;;  %v2369_v25 = vmax.f32 %v2367_v34, 0.0 }
 0x2d9   : > { %2370 = vst [vmem:[%s276_s13] sm:$0xff] %v2368_v59  ;;  %2371 = vst [vmem:[%s276_s13 + $0x8] sm:$0xff] %v2369_v25 }
 0x2da PF: > { %s15_s17 = sadd.s32 1, %s3573_s17   ;;  %s5466_s15 = smov %s3569_s16 }
 0x2db   : > { %p12_p5 = scmp.ge.s32.totalorder %s15_s17, 4   ;;  %s5467_s16 = smov %s5469_s18 }
 0x2dd   :  { %14 = sbr.rel (!%p12_p5) target bundleno = 2 (0x2), region = 84 }

</bundles_post_ra>
